<compile_context>
chip_gen: v5e
topology: v5e:2x2
jax: 0.10.0
libtpu: 0.0.40
codegen_flags: <defaults>
</compile_context>

<pallas_src>
import functools

import jax
import jax.numpy as jnp
from jax.experimental import pallas as pl
from jax.experimental.pallas import tpu as pltpu

LANE = 128
SUBLANE = 8


def _round_up(n, m):
    return ((n + m - 1) // m) * m


# ---------------------------------------------------------------------------
# In-kernel math helpers (exact erf-based GELU, matching torch.nn.GELU default)
# ---------------------------------------------------------------------------
def _erf(z):
    # Abramowitz & Stegun 7.1.26 rational approximation, |err| < 1.5e-7.
    # exp() runs on the EUP; the single divide lowers to reciprocal+refine.
    # TODO(synk): switch to lax.erf if/when Mosaic exposes a native erf lowering.
    a1 = 0.254829592
    a2 = -0.284496736
    a3 = 1.421413741
    a4 = -1.453152027
    a5 = 1.061405429
    p = 0.3275911
    az = jnp.abs(z)
    t = 1.0 / (1.0 + p * az)
    poly = ((((a5 * t + a4) * t + a3) * t + a2) * t + a1) * t
    y = 1.0 - poly * jnp.exp(-az * az)
    return jnp.where(z < 0.0, -y, y)


def _gelu(x):
    # exact GELU: 0.5 * x * (1 + erf(x / sqrt(2)))
    return 0.5 * x * (1.0 + _erf(x * 0.7071067811865476))


# ---------------------------------------------------------------------------
# Pallas kernel: the whole EncoderFC forward for one batch tile.
# Weight/bias refs are whole VMEM-resident arrays (lane-padded to 128).
# ---------------------------------------------------------------------------
def encoder_fc_kernel(
    x_ref,
    w_in_ref, b_in_ref,                                            # fc_in (+ implicit cat w/ zeros)
    r1w1_ref, r1b1_ref, r1w2_ref, r1b2_ref, r1w3_ref, r1b3_ref,    # res1
    w1_ref, b1_ref,                                                # fc1
    r2w1_ref, r2b1_ref, r2w2_ref, r2b2_ref, r2w3_ref, r2b3_ref,    # res2
    w2_ref, b2_ref,                                                # fc2
    o_ref,
):
    def linear(h, w_ref, b_ref):
        return (
            jnp.dot(h, w_ref[...], preferred_element_type=jnp.float32)
            + b_ref[...]
        )

    def res_block(h, wa, ba, wb, bb, wc, bc):
        t = _gelu(h)
        t = linear(t, wa, ba)
        t = _gelu(t)
        t = linear(t, wb, bb)
        t = _gelu(t)
        t = linear(t, wc, bc)
        return h + t

    x = x_ref[...].astype(jnp.float32)

    # fc_in + implicit concat with zeros (weight columns already zero-padded)
    h = linear(x, w_in_ref, b_in_ref)
    # res1
    h = res_block(h, r1w1_ref, r1b1_ref, r1w2_ref, r1b2_ref, r1w3_ref, r1b3_ref)
    # fc1(gelu(h))
    h = linear(_gelu(h), w1_ref, b1_ref)
    # res2
    h = res_block(h, r2w1_ref, r2b1_ref, r2w2_ref, r2b2_ref, r2w3_ref, r2b3_ref)
    # fc2(gelu(h))
    h = linear(_gelu(h), w2_ref, b2_ref)

    o_ref[...] = h.astype(o_ref.dtype)


# ---------------------------------------------------------------------------
# Parameter init (PyTorch nn.Linear-style uniform init), UNPADDED layout.
# Weights are stored as (in_features, out_features) so the kernel computes
# h @ W + b (== PyTorch's x @ W.T + b).
# ---------------------------------------------------------------------------
def _init_linear(key, fan_in, fan_out):
    kw, kb = jax.random.split(key)
    bound = 1.0 / float(jnp.sqrt(fan_in))
    w = jax.random.uniform(kw, (fan_in, fan_out), jnp.float32, -bound, bound)
    b = jax.random.uniform(kb, (fan_out,), jnp.float32, -bound, bound)
    return w, b


def make_encoder_fc_params(key, *, dim, d_hidden, d_residual, d_out):
    assert d_hidden % 2 == 0
    dh2 = d_hidden // 2
    keys = jax.random.split(key, 9)
    return {
        "fc_in": _init_linear(keys[0], dim, dh2),
        "res1": [
            _init_linear(keys[1], d_hidden, d_residual),
            _init_linear(keys[2], d_residual, d_residual),
            _init_linear(keys[3], d_residual, d_hidden),
        ],
        "fc1": _init_linear(keys[4], d_hidden, d_hidden),
        "res2": [
            _init_linear(keys[5], d_hidden, d_residual),
            _init_linear(keys[6], d_residual, d_residual),
            _init_linear(keys[7], d_residual, d_hidden),
        ],
        "fc2": _init_linear(keys[8], d_hidden, d_out),
    }


# ---------------------------------------------------------------------------
# Lane-pad all weights/biases to multiples of 128 and flatten to the kernel's
# argument order.  Zero padding is mathematically inert (see header comment).
# ---------------------------------------------------------------------------
def _pad_params(params, dim_p, dh_p, dr_p, do_p):
    def padw(w, rows_p, cols_p):
        r, c = w.shape
        return jnp.pad(w, ((0, rows_p - r), (0, cols_p - c)))

    def padb(b, cols_p):
        return jnp.pad(b.reshape(1, -1), ((0, 0), (0, cols_p - b.shape[0])))

    flat = []
    w, b = params["fc_in"]
    flat += [padw(w, dim_p, dh_p), padb(b, dh_p)]     # cols dh2..dh_p are zero == cat w/ zeros

    for block in ("res1",):
        (wa, ba), (wb, bb), (wc, bc) = params[block]
        flat += [padw(wa, dh_p, dr_p), padb(ba, dr_p),
                 padw(wb, dr_p, dr_p), padb(bb, dr_p),
                 padw(wc, dr_p, dh_p), padb(bc, dh_p)]

    w, b = params["fc1"]
    flat += [padw(w, dh_p, dh_p), padb(b, dh_p)]

    for block in ("res2",):
        (wa, ba), (wb, bb), (wc, bc) = params[block]
        flat += [padw(wa, dh_p, dr_p), padb(ba, dr_p),
                 padw(wb, dr_p, dr_p), padb(bb, dr_p),
                 padw(wc, dr_p, dh_p), padb(bc, dh_p)]

    w, b = params["fc2"]
    flat += [padw(w, dh_p, do_p), padb(b, do_p)]
    return flat


# ---------------------------------------------------------------------------
# Wrapper: pads batch + features, single lane-dense grid over batch tiles,
# VMEM-resident weights, slices the output back to (B, d_out).
# ---------------------------------------------------------------------------
def encoder_fc_forward(x, params, *, dim, d_hidden, d_residual, d_out, block_b=None):
    B = x.shape[0]
    assert x.shape[1] == dim

    dim_p = _round_up(dim, LANE)
    dh_p = _round_up(d_hidden, LANE)
    dr_p = _round_up(d_residual, LANE)
    do_p = _round_up(d_out, LANE)

    flat_w = _pad_params(params, dim_p, dh_p, dr_p, do_p)

    # Large batch tile: whole batch if it is small, otherwise 256-row tiles
    # (fills MXU rows on v5e/v6e/v7x; keep a multiple of the 8-sublane tile).
    if block_b is None:
        block_b = 256 if B >= 256 else _round_up(B, SUBLANE)
    block_b = _round_up(block_b, SUBLANE)
    B_p = _round_up(B, block_b)

    x_p = jnp.pad(x.astype(jnp.float32), ((0, B_p - B), (0, dim_p - dim)))

    grid = (B_p // block_b,)

    # Batch-tiled input/output; weights fully resident in VMEM (no per-step DMA,
    # no double-buffering of 18 small arrays).
    in_specs = [pl.BlockSpec((block_b, dim_p), lambda i: (i, 0))]
    in_specs += [pl.BlockSpec(memory_space=pltpu.MemorySpace.VMEM)] * len(flat_w)
    out_spec = pl.BlockSpec((block_b, do_p), lambda i: (i, 0))

    # Advisory cost hint for XLA scheduling around the custom call.
    flops_per_row = 2 * (
        dim_p * dh_p
        + 2 * (dh_p * dr_p + dr_p * dr_p + dr_p * dh_p)
        + dh_p * dh_p
        + dh_p * do_p
    )
    transcendentals = B_p * 4 * (dh_p + dr_p)            # one exp per GELU element
    bytes_accessed = (
        x_p.size * 4 + sum(int(a.size) * 4 for a in flat_w) + B_p * do_p * 4
    )
    cost = pl.CostEstimate(
        flops=B_p * flops_per_row,
        transcendentals=transcendentals,
        bytes_accessed=bytes_accessed,
    )

    out_p = pl.pallas_call(
        encoder_fc_kernel,
        out_shape=jax.ShapeDtypeStruct((B_p, do_p), jnp.float32),
        grid_spec=pltpu.PrefetchScalarGridSpec(
            num_scalar_prefetch=0,
            grid=grid,
            in_specs=in_specs,
            out_specs=out_spec,
        ),
        compiler_params=pltpu.CompilerParams(
            dimension_semantics=("parallel",),
        ),
        cost_estimate=cost,
    )(x_p, *flat_w)

    return out_p[:B, :d_out]


# ---------------------------------------------------------------------------
# Pure-JAX reference (mirrors the PyTorch forward exactly, unpadded params).
# ---------------------------------------------------------------------------
def encoder_fc_reference(x, params):
    gelu = functools.partial(jax.nn.gelu, approximate=False)

    def lin(h, wb):
        w, b = wb
        return h @ w + b

    def res(h, layers):
        t = gelu(h)
        t = lin(t, layers[0])
        t = gelu(t)
        t = lin(t, layers[1])
        t = gelu(t)
        t = lin(t, layers[2])
        return h + t

    h = lin(x, params["fc_in"])                      # fc_in
    c = jnp.zeros_like(h)                            # unconditional branch
    h = jnp.concatenate([h, c], axis=1)              # torch.cat([x, c], dim=1)
    h = res(h, params["res1"])
    h = lin(gelu(h), params["fc1"])
    h = res(h, params["res2"])
    h = lin(gelu(h), params["fc2"])
    return h


if __name__ == "__main__":
    # Small shapes consistent with EncoderFC(dim, d_hidden, d_out, d_residual)
    B, DIM, D_HIDDEN, D_RESIDUAL, D_OUT = 16, 32, 64, 128, 16

    key = jax.random.PRNGKey(0)
    kx, kp = jax.random.split(key)

    x = jax.random.normal(kx, (B, DIM), dtype=jnp.float32)
    params = make_encoder_fc_params(
        kp, dim=DIM, d_hidden=D_HIDDEN, d_residual=D_RESIDUAL, d_out=D_OUT
    )

    out = encoder_fc_forward(
        x, params, dim=DIM, d_hidden=D_HIDDEN, d_residual=D_RESIDUAL, d_out=D_OUT
    )
    out = jax.block_until_ready(out)

    ref = encoder_fc_reference(x, params)
    assert out.shape == (B, D_OUT)
    max_err = float(jnp.max(jnp.abs(out - ref)))
    assert jnp.allclose(out, ref, atol=1e-4, rtol=1e-4), max_err

    print("KERNEL_OK")
</pallas_src>

<mosaic_0001>
module attributes {stable_mosaic.version = 11 : i64} {
  func.func @encoder_fc_kernel(%arg0: i32, %arg1: memref<16x128xf32, #tpu.memory_space<vmem>>, %arg2: memref<128x128xf32, #tpu.memory_space<vmem>>, %arg3: memref<1x128xf32, #tpu.memory_space<vmem>>, %arg4: memref<128x128xf32, #tpu.memory_space<vmem>>, %arg5: memref<1x128xf32, #tpu.memory_space<vmem>>, %arg6: memref<128x128xf32, #tpu.memory_space<vmem>>, %arg7: memref<1x128xf32, #tpu.memory_space<vmem>>, %arg8: memref<128x128xf32, #tpu.memory_space<vmem>>, %arg9: memref<1x128xf32, #tpu.memory_space<vmem>>, %arg10: memref<128x128xf32, #tpu.memory_space<vmem>>, %arg11: memref<1x128xf32, #tpu.memory_space<vmem>>, %arg12: memref<128x128xf32, #tpu.memory_space<vmem>>, %arg13: memref<1x128xf32, #tpu.memory_space<vmem>>, %arg14: memref<128x128xf32, #tpu.memory_space<vmem>>, %arg15: memref<1x128xf32, #tpu.memory_space<vmem>>, %arg16: memref<128x128xf32, #tpu.memory_space<vmem>>, %arg17: memref<1x128xf32, #tpu.memory_space<vmem>>, %arg18: memref<128x128xf32, #tpu.memory_space<vmem>>, %arg19: memref<1x128xf32, #tpu.memory_space<vmem>>, %arg20: memref<16x128xf32, #tpu.memory_space<vmem>>) attributes {dimension_semantics = [#tpu.dimension_semantics<parallel>], iteration_bounds = array<i64: 1>, scalar_prefetch = 0 : i64, scratch_operands = 0 : i64, tpu.core_type = #tpu.core_type<tc>, window_params = [{transform_indices = @transform_0, window_bounds = array<i64: 16, 128>}, {pipeline_mode = #tpu.pipeline_mode<synchronous>, transform_indices = @transform_1, window_bounds = array<i64: 128, 128>}, {pipeline_mode = #tpu.pipeline_mode<synchronous>, transform_indices = @transform_2, window_bounds = array<i64: 1, 128>}, {pipeline_mode = #tpu.pipeline_mode<synchronous>, transform_indices = @transform_3, window_bounds = array<i64: 128, 128>}, {pipeline_mode = #tpu.pipeline_mode<synchronous>, transform_indices = @transform_4, window_bounds = array<i64: 1, 128>}, {pipeline_mode = #tpu.pipeline_mode<synchronous>, transform_indices = @transform_5, window_bounds = array<i64: 128, 128>}, {pipeline_mode = #tpu.pipeline_mode<synchronous>, transform_indices = @transform_6, window_bounds = array<i64: 1, 128>}, {pipeline_mode = #tpu.pipeline_mode<synchronous>, transform_indices = @transform_7, window_bounds = array<i64: 128, 128>}, {pipeline_mode = #tpu.pipeline_mode<synchronous>, transform_indices = @transform_8, window_bounds = array<i64: 1, 128>}, {pipeline_mode = #tpu.pipeline_mode<synchronous>, transform_indices = @transform_9, window_bounds = array<i64: 128, 128>}, {pipeline_mode = #tpu.pipeline_mode<synchronous>, transform_indices = @transform_10, window_bounds = array<i64: 1, 128>}, {pipeline_mode = #tpu.pipeline_mode<synchronous>, transform_indices = @transform_11, window_bounds = array<i64: 128, 128>}, {pipeline_mode = #tpu.pipeline_mode<synchronous>, transform_indices = @transform_12, window_bounds = array<i64: 1, 128>}, {pipeline_mode = #tpu.pipeline_mode<synchronous>, transform_indices = @transform_13, window_bounds = array<i64: 128, 128>}, {pipeline_mode = #tpu.pipeline_mode<synchronous>, transform_indices = @transform_14, window_bounds = array<i64: 1, 128>}, {pipeline_mode = #tpu.pipeline_mode<synchronous>, transform_indices = @transform_15, window_bounds = array<i64: 128, 128>}, {pipeline_mode = #tpu.pipeline_mode<synchronous>, transform_indices = @transform_16, window_bounds = array<i64: 1, 128>}, {pipeline_mode = #tpu.pipeline_mode<synchronous>, transform_indices = @transform_17, window_bounds = array<i64: 128, 128>}, {pipeline_mode = #tpu.pipeline_mode<synchronous>, transform_indices = @transform_18, window_bounds = array<i64: 1, 128>}, {transform_indices = @transform_19, window_bounds = array<i64: 16, 128>}]} {
    %c0 = arith.constant 0 : index
    %c0_0 = arith.constant 0 : index
    %0 = vector.load %arg1[%c0, %c0_0] : memref<16x128xf32, #tpu.memory_space<vmem>>, vector<16x128xf32>
    %c0_1 = arith.constant 0 : index
    %c0_2 = arith.constant 0 : index
    %1 = vector.load %arg2[%c0_1, %c0_2] : memref<128x128xf32, #tpu.memory_space<vmem>>, vector<128x128xf32>
    %cst = arith.constant dense<0.000000e+00> : vector<16x128xf32>
    %2 = tpu.matmul %0, %1, %cst {dimension_numbers = #tpu.dot_dimension_numbers<[1], [0], [0], [1], [0, 0, 1, 1], [], []>} : vector<16x128xf32>, vector<128x128xf32>, vector<16x128xf32> -> vector<16x128xf32>
    %c0_3 = arith.constant 0 : index
    %c0_4 = arith.constant 0 : index
    %3 = vector.load %arg3[%c0_3, %c0_4] : memref<1x128xf32, #tpu.memory_space<vmem>>, vector<1x128xf32>
    %4 = vector.broadcast %3 : vector<1x128xf32> to vector<16x128xf32>
    %5 = arith.addf %2, %4 : vector<16x128xf32>
    %cst_5 = arith.constant 5.000000e-01 : f32
    %6 = vector.broadcast %cst_5 : f32 to vector<16x128xf32>
    %7 = arith.mulf %6, %5 : vector<16x128xf32>
    %cst_6 = arith.constant 0.707106769 : f32
    %8 = vector.broadcast %cst_6 : f32 to vector<16x128xf32>
    %9 = arith.mulf %5, %8 : vector<16x128xf32>
    %10 = math.absf %9 : vector<16x128xf32>
    %cst_7 = arith.constant 0.327591091 : f32
    %11 = vector.broadcast %cst_7 : f32 to vector<16x128xf32>
    %12 = arith.mulf %11, %10 : vector<16x128xf32>
    %cst_8 = arith.constant 1.000000e+00 : f32
    %13 = vector.broadcast %cst_8 : f32 to vector<16x128xf32>
    %14 = arith.addf %13, %12 : vector<16x128xf32>
    %cst_9 = arith.constant 1.000000e+00 : f32
    %15 = vector.broadcast %cst_9 : f32 to vector<16x128xf32>
    %16 = arith.divf %15, %14 : vector<16x128xf32>
    %cst_10 = arith.constant 1.06140542 : f32
    %17 = vector.broadcast %cst_10 : f32 to vector<16x128xf32>
    %18 = arith.mulf %17, %16 : vector<16x128xf32>
    %cst_11 = arith.constant -1.45315206 : f32
    %19 = vector.broadcast %cst_11 : f32 to vector<16x128xf32>
    %20 = arith.addf %18, %19 : vector<16x128xf32>
    %21 = arith.mulf %20, %16 : vector<16x128xf32>
    %cst_12 = arith.constant 1.42141378 : f32
    %22 = vector.broadcast %cst_12 : f32 to vector<16x128xf32>
    %23 = arith.addf %21, %22 : vector<16x128xf32>
    %24 = arith.mulf %23, %16 : vector<16x128xf32>
    %cst_13 = arith.constant -0.284496725 : f32
    %25 = vector.broadcast %cst_13 : f32 to vector<16x128xf32>
    %26 = arith.addf %24, %25 : vector<16x128xf32>
    %27 = arith.mulf %26, %16 : vector<16x128xf32>
    %cst_14 = arith.constant 0.254829586 : f32
    %28 = vector.broadcast %cst_14 : f32 to vector<16x128xf32>
    %29 = arith.addf %27, %28 : vector<16x128xf32>
    %30 = arith.mulf %29, %16 : vector<16x128xf32>
    %cst_15 = arith.constant 0.000000e+00 : f32
    %31 = vector.broadcast %cst_15 : f32 to vector<16x128xf32>
    %32 = arith.subf %31, %10 : vector<16x128xf32>
    %33 = arith.mulf %32, %10 : vector<16x128xf32>
    %34 = math.exp %33 : vector<16x128xf32>
    %35 = arith.mulf %30, %34 : vector<16x128xf32>
    %cst_16 = arith.constant 1.000000e+00 : f32
    %36 = vector.broadcast %cst_16 : f32 to vector<16x128xf32>
    %37 = arith.subf %36, %35 : vector<16x128xf32>
    %cst_17 = arith.constant 0.000000e+00 : f32
    %38 = vector.broadcast %cst_17 : f32 to vector<16x128xf32>
    %39 = arith.cmpf olt, %9, %38 : vector<16x128xf32>
    %cst_18 = arith.constant 0.000000e+00 : f32
    %40 = vector.broadcast %cst_18 : f32 to vector<16x128xf32>
    %41 = arith.subf %40, %37 : vector<16x128xf32>
    %42 = arith.select %39, %41, %37 : vector<16x128xi1>, vector<16x128xf32>
    %cst_19 = arith.constant 1.000000e+00 : f32
    %43 = vector.broadcast %cst_19 : f32 to vector<16x128xf32>
    %44 = arith.addf %43, %42 : vector<16x128xf32>
    %45 = arith.mulf %7, %44 : vector<16x128xf32>
    %c0_20 = arith.constant 0 : index
    %c0_21 = arith.constant 0 : index
    %46 = vector.load %arg4[%c0_20, %c0_21] : memref<128x128xf32, #tpu.memory_space<vmem>>, vector<128x128xf32>
    %cst_22 = arith.constant dense<0.000000e+00> : vector<16x128xf32>
    %47 = tpu.matmul %45, %46, %cst_22 {dimension_numbers = #tpu.dot_dimension_numbers<[1], [0], [0], [1], [0, 0, 1, 1], [], []>} : vector<16x128xf32>, vector<128x128xf32>, vector<16x128xf32> -> vector<16x128xf32>
    %c0_23 = arith.constant 0 : index
    %c0_24 = arith.constant 0 : index
    %48 = vector.load %arg5[%c0_23, %c0_24] : memref<1x128xf32, #tpu.memory_space<vmem>>, vector<1x128xf32>
    %49 = vector.broadcast %48 : vector<1x128xf32> to vector<16x128xf32>
    %50 = arith.addf %47, %49 : vector<16x128xf32>
    %cst_25 = arith.constant 5.000000e-01 : f32
    %51 = vector.broadcast %cst_25 : f32 to vector<16x128xf32>
    %52 = arith.mulf %51, %50 : vector<16x128xf32>
    %cst_26 = arith.constant 0.707106769 : f32
    %53 = vector.broadcast %cst_26 : f32 to vector<16x128xf32>
    %54 = arith.mulf %50, %53 : vector<16x128xf32>
    %55 = math.absf %54 : vector<16x128xf32>
    %cst_27 = arith.constant 0.327591091 : f32
    %56 = vector.broadcast %cst_27 : f32 to vector<16x128xf32>
    %57 = arith.mulf %56, %55 : vector<16x128xf32>
    %cst_28 = arith.constant 1.000000e+00 : f32
    %58 = vector.broadcast %cst_28 : f32 to vector<16x128xf32>
    %59 = arith.addf %58, %57 : vector<16x128xf32>
    %cst_29 = arith.constant 1.000000e+00 : f32
    %60 = vector.broadcast %cst_29 : f32 to vector<16x128xf32>
    %61 = arith.divf %60, %59 : vector<16x128xf32>
    %cst_30 = arith.constant 1.06140542 : f32
    %62 = vector.broadcast %cst_30 : f32 to vector<16x128xf32>
    %63 = arith.mulf %62, %61 : vector<16x128xf32>
    %cst_31 = arith.constant -1.45315206 : f32
    %64 = vector.broadcast %cst_31 : f32 to vector<16x128xf32>
    %65 = arith.addf %63, %64 : vector<16x128xf32>
    %66 = arith.mulf %65, %61 : vector<16x128xf32>
    %cst_32 = arith.constant 1.42141378 : f32
    %67 = vector.broadcast %cst_32 : f32 to vector<16x128xf32>
    %68 = arith.addf %66, %67 : vector<16x128xf32>
    %69 = arith.mulf %68, %61 : vector<16x128xf32>
    %cst_33 = arith.constant -0.284496725 : f32
    %70 = vector.broadcast %cst_33 : f32 to vector<16x128xf32>
    %71 = arith.addf %69, %70 : vector<16x128xf32>
    %72 = arith.mulf %71, %61 : vector<16x128xf32>
    %cst_34 = arith.constant 0.254829586 : f32
    %73 = vector.broadcast %cst_34 : f32 to vector<16x128xf32>
    %74 = arith.addf %72, %73 : vector<16x128xf32>
    %75 = arith.mulf %74, %61 : vector<16x128xf32>
    %cst_35 = arith.constant 0.000000e+00 : f32
    %76 = vector.broadcast %cst_35 : f32 to vector<16x128xf32>
    %77 = arith.subf %76, %55 : vector<16x128xf32>
    %78 = arith.mulf %77, %55 : vector<16x128xf32>
    %79 = math.exp %78 : vector<16x128xf32>
    %80 = arith.mulf %75, %79 : vector<16x128xf32>
    %cst_36 = arith.constant 1.000000e+00 : f32
    %81 = vector.broadcast %cst_36 : f32 to vector<16x128xf32>
    %82 = arith.subf %81, %80 : vector<16x128xf32>
    %cst_37 = arith.constant 0.000000e+00 : f32
    %83 = vector.broadcast %cst_37 : f32 to vector<16x128xf32>
    %84 = arith.cmpf olt, %54, %83 : vector<16x128xf32>
    %cst_38 = arith.constant 0.000000e+00 : f32
    %85 = vector.broadcast %cst_38 : f32 to vector<16x128xf32>
    %86 = arith.subf %85, %82 : vector<16x128xf32>
    %87 = arith.select %84, %86, %82 : vector<16x128xi1>, vector<16x128xf32>
    %cst_39 = arith.constant 1.000000e+00 : f32
    %88 = vector.broadcast %cst_39 : f32 to vector<16x128xf32>
    %89 = arith.addf %88, %87 : vector<16x128xf32>
    %90 = arith.mulf %52, %89 : vector<16x128xf32>
    %c0_40 = arith.constant 0 : index
    %c0_41 = arith.constant 0 : index
    %91 = vector.load %arg6[%c0_40, %c0_41] : memref<128x128xf32, #tpu.memory_space<vmem>>, vector<128x128xf32>
    %cst_42 = arith.constant dense<0.000000e+00> : vector<16x128xf32>
    %92 = tpu.matmul %90, %91, %cst_42 {dimension_numbers = #tpu.dot_dimension_numbers<[1], [0], [0], [1], [0, 0, 1, 1], [], []>} : vector<16x128xf32>, vector<128x128xf32>, vector<16x128xf32> -> vector<16x128xf32>
    %c0_43 = arith.constant 0 : index
    %c0_44 = arith.constant 0 : index
    %93 = vector.load %arg7[%c0_43, %c0_44] : memref<1x128xf32, #tpu.memory_space<vmem>>, vector<1x128xf32>
    %94 = vector.broadcast %93 : vector<1x128xf32> to vector<16x128xf32>
    %95 = arith.addf %92, %94 : vector<16x128xf32>
    %cst_45 = arith.constant 5.000000e-01 : f32
    %96 = vector.broadcast %cst_45 : f32 to vector<16x128xf32>
    %97 = arith.mulf %96, %95 : vector<16x128xf32>
    %cst_46 = arith.constant 0.707106769 : f32
    %98 = vector.broadcast %cst_46 : f32 to vector<16x128xf32>
    %99 = arith.mulf %95, %98 : vector<16x128xf32>
    %100 = math.absf %99 : vector<16x128xf32>
    %cst_47 = arith.constant 0.327591091 : f32
    %101 = vector.broadcast %cst_47 : f32 to vector<16x128xf32>
    %102 = arith.mulf %101, %100 : vector<16x128xf32>
    %cst_48 = arith.constant 1.000000e+00 : f32
    %103 = vector.broadcast %cst_48 : f32 to vector<16x128xf32>
    %104 = arith.addf %103, %102 : vector<16x128xf32>
    %cst_49 = arith.constant 1.000000e+00 : f32
    %105 = vector.broadcast %cst_49 : f32 to vector<16x128xf32>
    %106 = arith.divf %105, %104 : vector<16x128xf32>
    %cst_50 = arith.constant 1.06140542 : f32
    %107 = vector.broadcast %cst_50 : f32 to vector<16x128xf32>
    %108 = arith.mulf %107, %106 : vector<16x128xf32>
    %cst_51 = arith.constant -1.45315206 : f32
    %109 = vector.broadcast %cst_51 : f32 to vector<16x128xf32>
    %110 = arith.addf %108, %109 : vector<16x128xf32>
    %111 = arith.mulf %110, %106 : vector<16x128xf32>
    %cst_52 = arith.constant 1.42141378 : f32
    %112 = vector.broadcast %cst_52 : f32 to vector<16x128xf32>
    %113 = arith.addf %111, %112 : vector<16x128xf32>
    %114 = arith.mulf %113, %106 : vector<16x128xf32>
    %cst_53 = arith.constant -0.284496725 : f32
    %115 = vector.broadcast %cst_53 : f32 to vector<16x128xf32>
    %116 = arith.addf %114, %115 : vector<16x128xf32>
    %117 = arith.mulf %116, %106 : vector<16x128xf32>
    %cst_54 = arith.constant 0.254829586 : f32
    %118 = vector.broadcast %cst_54 : f32 to vector<16x128xf32>
    %119 = arith.addf %117, %118 : vector<16x128xf32>
    %120 = arith.mulf %119, %106 : vector<16x128xf32>
    %cst_55 = arith.constant 0.000000e+00 : f32
    %121 = vector.broadcast %cst_55 : f32 to vector<16x128xf32>
    %122 = arith.subf %121, %100 : vector<16x128xf32>
    %123 = arith.mulf %122, %100 : vector<16x128xf32>
    %124 = math.exp %123 : vector<16x128xf32>
    %125 = arith.mulf %120, %124 : vector<16x128xf32>
    %cst_56 = arith.constant 1.000000e+00 : f32
    %126 = vector.broadcast %cst_56 : f32 to vector<16x128xf32>
    %127 = arith.subf %126, %125 : vector<16x128xf32>
    %cst_57 = arith.constant 0.000000e+00 : f32
    %128 = vector.broadcast %cst_57 : f32 to vector<16x128xf32>
    %129 = arith.cmpf olt, %99, %128 : vector<16x128xf32>
    %cst_58 = arith.constant 0.000000e+00 : f32
    %130 = vector.broadcast %cst_58 : f32 to vector<16x128xf32>
    %131 = arith.subf %130, %127 : vector<16x128xf32>
    %132 = arith.select %129, %131, %127 : vector<16x128xi1>, vector<16x128xf32>
    %cst_59 = arith.constant 1.000000e+00 : f32
    %133 = vector.broadcast %cst_59 : f32 to vector<16x128xf32>
    %134 = arith.addf %133, %132 : vector<16x128xf32>
    %135 = arith.mulf %97, %134 : vector<16x128xf32>
    %c0_60 = arith.constant 0 : index
    %c0_61 = arith.constant 0 : index
    %136 = vector.load %arg8[%c0_60, %c0_61] : memref<128x128xf32, #tpu.memory_space<vmem>>, vector<128x128xf32>
    %cst_62 = arith.constant dense<0.000000e+00> : vector<16x128xf32>
    %137 = tpu.matmul %135, %136, %cst_62 {dimension_numbers = #tpu.dot_dimension_numbers<[1], [0], [0], [1], [0, 0, 1, 1], [], []>} : vector<16x128xf32>, vector<128x128xf32>, vector<16x128xf32> -> vector<16x128xf32>
    %c0_63 = arith.constant 0 : index
    %c0_64 = arith.constant 0 : index
    %138 = vector.load %arg9[%c0_63, %c0_64] : memref<1x128xf32, #tpu.memory_space<vmem>>, vector<1x128xf32>
    %139 = vector.broadcast %138 : vector<1x128xf32> to vector<16x128xf32>
    %140 = arith.addf %137, %139 : vector<16x128xf32>
    %141 = arith.addf %5, %140 : vector<16x128xf32>
    %cst_65 = arith.constant 5.000000e-01 : f32
    %142 = vector.broadcast %cst_65 : f32 to vector<16x128xf32>
    %143 = arith.mulf %142, %141 : vector<16x128xf32>
    %cst_66 = arith.constant 0.707106769 : f32
    %144 = vector.broadcast %cst_66 : f32 to vector<16x128xf32>
    %145 = arith.mulf %141, %144 : vector<16x128xf32>
    %146 = math.absf %145 : vector<16x128xf32>
    %cst_67 = arith.constant 0.327591091 : f32
    %147 = vector.broadcast %cst_67 : f32 to vector<16x128xf32>
    %148 = arith.mulf %147, %146 : vector<16x128xf32>
    %cst_68 = arith.constant 1.000000e+00 : f32
    %149 = vector.broadcast %cst_68 : f32 to vector<16x128xf32>
    %150 = arith.addf %149, %148 : vector<16x128xf32>
    %cst_69 = arith.constant 1.000000e+00 : f32
    %151 = vector.broadcast %cst_69 : f32 to vector<16x128xf32>
    %152 = arith.divf %151, %150 : vector<16x128xf32>
    %cst_70 = arith.constant 1.06140542 : f32
    %153 = vector.broadcast %cst_70 : f32 to vector<16x128xf32>
    %154 = arith.mulf %153, %152 : vector<16x128xf32>
    %cst_71 = arith.constant -1.45315206 : f32
    %155 = vector.broadcast %cst_71 : f32 to vector<16x128xf32>
    %156 = arith.addf %154, %155 : vector<16x128xf32>
    %157 = arith.mulf %156, %152 : vector<16x128xf32>
    %cst_72 = arith.constant 1.42141378 : f32
    %158 = vector.broadcast %cst_72 : f32 to vector<16x128xf32>
    %159 = arith.addf %157, %158 : vector<16x128xf32>
    %160 = arith.mulf %159, %152 : vector<16x128xf32>
    %cst_73 = arith.constant -0.284496725 : f32
    %161 = vector.broadcast %cst_73 : f32 to vector<16x128xf32>
    %162 = arith.addf %160, %161 : vector<16x128xf32>
    %163 = arith.mulf %162, %152 : vector<16x128xf32>
    %cst_74 = arith.constant 0.254829586 : f32
    %164 = vector.broadcast %cst_74 : f32 to vector<16x128xf32>
    %165 = arith.addf %163, %164 : vector<16x128xf32>
    %166 = arith.mulf %165, %152 : vector<16x128xf32>
    %cst_75 = arith.constant 0.000000e+00 : f32
    %167 = vector.broadcast %cst_75 : f32 to vector<16x128xf32>
    %168 = arith.subf %167, %146 : vector<16x128xf32>
    %169 = arith.mulf %168, %146 : vector<16x128xf32>
    %170 = math.exp %169 : vector<16x128xf32>
    %171 = arith.mulf %166, %170 : vector<16x128xf32>
    %cst_76 = arith.constant 1.000000e+00 : f32
    %172 = vector.broadcast %cst_76 : f32 to vector<16x128xf32>
    %173 = arith.subf %172, %171 : vector<16x128xf32>
    %cst_77 = arith.constant 0.000000e+00 : f32
    %174 = vector.broadcast %cst_77 : f32 to vector<16x128xf32>
    %175 = arith.cmpf olt, %145, %174 : vector<16x128xf32>
    %cst_78 = arith.constant 0.000000e+00 : f32
    %176 = vector.broadcast %cst_78 : f32 to vector<16x128xf32>
    %177 = arith.subf %176, %173 : vector<16x128xf32>
    %178 = arith.select %175, %177, %173 : vector<16x128xi1>, vector<16x128xf32>
    %cst_79 = arith.constant 1.000000e+00 : f32
    %179 = vector.broadcast %cst_79 : f32 to vector<16x128xf32>
    %180 = arith.addf %179, %178 : vector<16x128xf32>
    %181 = arith.mulf %143, %180 : vector<16x128xf32>
    %c0_80 = arith.constant 0 : index
    %c0_81 = arith.constant 0 : index
    %182 = vector.load %arg10[%c0_80, %c0_81] : memref<128x128xf32, #tpu.memory_space<vmem>>, vector<128x128xf32>
    %cst_82 = arith.constant dense<0.000000e+00> : vector<16x128xf32>
    %183 = tpu.matmul %181, %182, %cst_82 {dimension_numbers = #tpu.dot_dimension_numbers<[1], [0], [0], [1], [0, 0, 1, 1], [], []>} : vector<16x128xf32>, vector<128x128xf32>, vector<16x128xf32> -> vector<16x128xf32>
    %c0_83 = arith.constant 0 : index
    %c0_84 = arith.constant 0 : index
    %184 = vector.load %arg11[%c0_83, %c0_84] : memref<1x128xf32, #tpu.memory_space<vmem>>, vector<1x128xf32>
    %185 = vector.broadcast %184 : vector<1x128xf32> to vector<16x128xf32>
    %186 = arith.addf %183, %185 : vector<16x128xf32>
    %cst_85 = arith.constant 5.000000e-01 : f32
    %187 = vector.broadcast %cst_85 : f32 to vector<16x128xf32>
    %188 = arith.mulf %187, %186 : vector<16x128xf32>
    %cst_86 = arith.constant 0.707106769 : f32
    %189 = vector.broadcast %cst_86 : f32 to vector<16x128xf32>
    %190 = arith.mulf %186, %189 : vector<16x128xf32>
    %191 = math.absf %190 : vector<16x128xf32>
    %cst_87 = arith.constant 0.327591091 : f32
    %192 = vector.broadcast %cst_87 : f32 to vector<16x128xf32>
    %193 = arith.mulf %192, %191 : vector<16x128xf32>
    %cst_88 = arith.constant 1.000000e+00 : f32
    %194 = vector.broadcast %cst_88 : f32 to vector<16x128xf32>
    %195 = arith.addf %194, %193 : vector<16x128xf32>
    %cst_89 = arith.constant 1.000000e+00 : f32
    %196 = vector.broadcast %cst_89 : f32 to vector<16x128xf32>
    %197 = arith.divf %196, %195 : vector<16x128xf32>
    %cst_90 = arith.constant 1.06140542 : f32
    %198 = vector.broadcast %cst_90 : f32 to vector<16x128xf32>
    %199 = arith.mulf %198, %197 : vector<16x128xf32>
    %cst_91 = arith.constant -1.45315206 : f32
    %200 = vector.broadcast %cst_91 : f32 to vector<16x128xf32>
    %201 = arith.addf %199, %200 : vector<16x128xf32>
    %202 = arith.mulf %201, %197 : vector<16x128xf32>
    %cst_92 = arith.constant 1.42141378 : f32
    %203 = vector.broadcast %cst_92 : f32 to vector<16x128xf32>
    %204 = arith.addf %202, %203 : vector<16x128xf32>
    %205 = arith.mulf %204, %197 : vector<16x128xf32>
    %cst_93 = arith.constant -0.284496725 : f32
    %206 = vector.broadcast %cst_93 : f32 to vector<16x128xf32>
    %207 = arith.addf %205, %206 : vector<16x128xf32>
    %208 = arith.mulf %207, %197 : vector<16x128xf32>
    %cst_94 = arith.constant 0.254829586 : f32
    %209 = vector.broadcast %cst_94 : f32 to vector<16x128xf32>
    %210 = arith.addf %208, %209 : vector<16x128xf32>
    %211 = arith.mulf %210, %197 : vector<16x128xf32>
    %cst_95 = arith.constant 0.000000e+00 : f32
    %212 = vector.broadcast %cst_95 : f32 to vector<16x128xf32>
    %213 = arith.subf %212, %191 : vector<16x128xf32>
    %214 = arith.mulf %213, %191 : vector<16x128xf32>
    %215 = math.exp %214 : vector<16x128xf32>
    %216 = arith.mulf %211, %215 : vector<16x128xf32>
    %cst_96 = arith.constant 1.000000e+00 : f32
    %217 = vector.broadcast %cst_96 : f32 to vector<16x128xf32>
    %218 = arith.subf %217, %216 : vector<16x128xf32>
    %cst_97 = arith.constant 0.000000e+00 : f32
    %219 = vector.broadcast %cst_97 : f32 to vector<16x128xf32>
    %220 = arith.cmpf olt, %190, %219 : vector<16x128xf32>
    %cst_98 = arith.constant 0.000000e+00 : f32
    %221 = vector.broadcast %cst_98 : f32 to vector<16x128xf32>
    %222 = arith.subf %221, %218 : vector<16x128xf32>
    %223 = arith.select %220, %222, %218 : vector<16x128xi1>, vector<16x128xf32>
    %cst_99 = arith.constant 1.000000e+00 : f32
    %224 = vector.broadcast %cst_99 : f32 to vector<16x128xf32>
    %225 = arith.addf %224, %223 : vector<16x128xf32>
    %226 = arith.mulf %188, %225 : vector<16x128xf32>
    %c0_100 = arith.constant 0 : index
    %c0_101 = arith.constant 0 : index
    %227 = vector.load %arg12[%c0_100, %c0_101] : memref<128x128xf32, #tpu.memory_space<vmem>>, vector<128x128xf32>
    %cst_102 = arith.constant dense<0.000000e+00> : vector<16x128xf32>
    %228 = tpu.matmul %226, %227, %cst_102 {dimension_numbers = #tpu.dot_dimension_numbers<[1], [0], [0], [1], [0, 0, 1, 1], [], []>} : vector<16x128xf32>, vector<128x128xf32>, vector<16x128xf32> -> vector<16x128xf32>
    %c0_103 = arith.constant 0 : index
    %c0_104 = arith.constant 0 : index
    %229 = vector.load %arg13[%c0_103, %c0_104] : memref<1x128xf32, #tpu.memory_space<vmem>>, vector<1x128xf32>
    %230 = vector.broadcast %229 : vector<1x128xf32> to vector<16x128xf32>
    %231 = arith.addf %228, %230 : vector<16x128xf32>
    %cst_105 = arith.constant 5.000000e-01 : f32
    %232 = vector.broadcast %cst_105 : f32 to vector<16x128xf32>
    %233 = arith.mulf %232, %231 : vector<16x128xf32>
    %cst_106 = arith.constant 0.707106769 : f32
    %234 = vector.broadcast %cst_106 : f32 to vector<16x128xf32>
    %235 = arith.mulf %231, %234 : vector<16x128xf32>
    %236 = math.absf %235 : vector<16x128xf32>
    %cst_107 = arith.constant 0.327591091 : f32
    %237 = vector.broadcast %cst_107 : f32 to vector<16x128xf32>
    %238 = arith.mulf %237, %236 : vector<16x128xf32>
    %cst_108 = arith.constant 1.000000e+00 : f32
    %239 = vector.broadcast %cst_108 : f32 to vector<16x128xf32>
    %240 = arith.addf %239, %238 : vector<16x128xf32>
    %cst_109 = arith.constant 1.000000e+00 : f32
    %241 = vector.broadcast %cst_109 : f32 to vector<16x128xf32>
    %242 = arith.divf %241, %240 : vector<16x128xf32>
    %cst_110 = arith.constant 1.06140542 : f32
    %243 = vector.broadcast %cst_110 : f32 to vector<16x128xf32>
    %244 = arith.mulf %243, %242 : vector<16x128xf32>
    %cst_111 = arith.constant -1.45315206 : f32
    %245 = vector.broadcast %cst_111 : f32 to vector<16x128xf32>
    %246 = arith.addf %244, %245 : vector<16x128xf32>
    %247 = arith.mulf %246, %242 : vector<16x128xf32>
    %cst_112 = arith.constant 1.42141378 : f32
    %248 = vector.broadcast %cst_112 : f32 to vector<16x128xf32>
    %249 = arith.addf %247, %248 : vector<16x128xf32>
    %250 = arith.mulf %249, %242 : vector<16x128xf32>
    %cst_113 = arith.constant -0.284496725 : f32
    %251 = vector.broadcast %cst_113 : f32 to vector<16x128xf32>
    %252 = arith.addf %250, %251 : vector<16x128xf32>
    %253 = arith.mulf %252, %242 : vector<16x128xf32>
    %cst_114 = arith.constant 0.254829586 : f32
    %254 = vector.broadcast %cst_114 : f32 to vector<16x128xf32>
    %255 = arith.addf %253, %254 : vector<16x128xf32>
    %256 = arith.mulf %255, %242 : vector<16x128xf32>
    %cst_115 = arith.constant 0.000000e+00 : f32
    %257 = vector.broadcast %cst_115 : f32 to vector<16x128xf32>
    %258 = arith.subf %257, %236 : vector<16x128xf32>
    %259 = arith.mulf %258, %236 : vector<16x128xf32>
    %260 = math.exp %259 : vector<16x128xf32>
    %261 = arith.mulf %256, %260 : vector<16x128xf32>
    %cst_116 = arith.constant 1.000000e+00 : f32
    %262 = vector.broadcast %cst_116 : f32 to vector<16x128xf32>
    %263 = arith.subf %262, %261 : vector<16x128xf32>
    %cst_117 = arith.constant 0.000000e+00 : f32
    %264 = vector.broadcast %cst_117 : f32 to vector<16x128xf32>
    %265 = arith.cmpf olt, %235, %264 : vector<16x128xf32>
    %cst_118 = arith.constant 0.000000e+00 : f32
    %266 = vector.broadcast %cst_118 : f32 to vector<16x128xf32>
    %267 = arith.subf %266, %263 : vector<16x128xf32>
    %268 = arith.select %265, %267, %263 : vector<16x128xi1>, vector<16x128xf32>
    %cst_119 = arith.constant 1.000000e+00 : f32
    %269 = vector.broadcast %cst_119 : f32 to vector<16x128xf32>
    %270 = arith.addf %269, %268 : vector<16x128xf32>
    %271 = arith.mulf %233, %270 : vector<16x128xf32>
    %c0_120 = arith.constant 0 : index
    %c0_121 = arith.constant 0 : index
    %272 = vector.load %arg14[%c0_120, %c0_121] : memref<128x128xf32, #tpu.memory_space<vmem>>, vector<128x128xf32>
    %cst_122 = arith.constant dense<0.000000e+00> : vector<16x128xf32>
    %273 = tpu.matmul %271, %272, %cst_122 {dimension_numbers = #tpu.dot_dimension_numbers<[1], [0], [0], [1], [0, 0, 1, 1], [], []>} : vector<16x128xf32>, vector<128x128xf32>, vector<16x128xf32> -> vector<16x128xf32>
    %c0_123 = arith.constant 0 : index
    %c0_124 = arith.constant 0 : index
    %274 = vector.load %arg15[%c0_123, %c0_124] : memref<1x128xf32, #tpu.memory_space<vmem>>, vector<1x128xf32>
    %275 = vector.broadcast %274 : vector<1x128xf32> to vector<16x128xf32>
    %276 = arith.addf %273, %275 : vector<16x128xf32>
    %cst_125 = arith.constant 5.000000e-01 : f32
    %277 = vector.broadcast %cst_125 : f32 to vector<16x128xf32>
    %278 = arith.mulf %277, %276 : vector<16x128xf32>
    %cst_126 = arith.constant 0.707106769 : f32
    %279 = vector.broadcast %cst_126 : f32 to vector<16x128xf32>
    %280 = arith.mulf %276, %279 : vector<16x128xf32>
    %281 = math.absf %280 : vector<16x128xf32>
    %cst_127 = arith.constant 0.327591091 : f32
    %282 = vector.broadcast %cst_127 : f32 to vector<16x128xf32>
    %283 = arith.mulf %282, %281 : vector<16x128xf32>
    %cst_128 = arith.constant 1.000000e+00 : f32
    %284 = vector.broadcast %cst_128 : f32 to vector<16x128xf32>
    %285 = arith.addf %284, %283 : vector<16x128xf32>
    %cst_129 = arith.constant 1.000000e+00 : f32
    %286 = vector.broadcast %cst_129 : f32 to vector<16x128xf32>
    %287 = arith.divf %286, %285 : vector<16x128xf32>
    %cst_130 = arith.constant 1.06140542 : f32
    %288 = vector.broadcast %cst_130 : f32 to vector<16x128xf32>
    %289 = arith.mulf %288, %287 : vector<16x128xf32>
    %cst_131 = arith.constant -1.45315206 : f32
    %290 = vector.broadcast %cst_131 : f32 to vector<16x128xf32>
    %291 = arith.addf %289, %290 : vector<16x128xf32>
    %292 = arith.mulf %291, %287 : vector<16x128xf32>
    %cst_132 = arith.constant 1.42141378 : f32
    %293 = vector.broadcast %cst_132 : f32 to vector<16x128xf32>
    %294 = arith.addf %292, %293 : vector<16x128xf32>
    %295 = arith.mulf %294, %287 : vector<16x128xf32>
    %cst_133 = arith.constant -0.284496725 : f32
    %296 = vector.broadcast %cst_133 : f32 to vector<16x128xf32>
    %297 = arith.addf %295, %296 : vector<16x128xf32>
    %298 = arith.mulf %297, %287 : vector<16x128xf32>
    %cst_134 = arith.constant 0.254829586 : f32
    %299 = vector.broadcast %cst_134 : f32 to vector<16x128xf32>
    %300 = arith.addf %298, %299 : vector<16x128xf32>
    %301 = arith.mulf %300, %287 : vector<16x128xf32>
    %cst_135 = arith.constant 0.000000e+00 : f32
    %302 = vector.broadcast %cst_135 : f32 to vector<16x128xf32>
    %303 = arith.subf %302, %281 : vector<16x128xf32>
    %304 = arith.mulf %303, %281 : vector<16x128xf32>
    %305 = math.exp %304 : vector<16x128xf32>
    %306 = arith.mulf %301, %305 : vector<16x128xf32>
    %cst_136 = arith.constant 1.000000e+00 : f32
    %307 = vector.broadcast %cst_136 : f32 to vector<16x128xf32>
    %308 = arith.subf %307, %306 : vector<16x128xf32>
    %cst_137 = arith.constant 0.000000e+00 : f32
    %309 = vector.broadcast %cst_137 : f32 to vector<16x128xf32>
    %310 = arith.cmpf olt, %280, %309 : vector<16x128xf32>
    %cst_138 = arith.constant 0.000000e+00 : f32
    %311 = vector.broadcast %cst_138 : f32 to vector<16x128xf32>
    %312 = arith.subf %311, %308 : vector<16x128xf32>
    %313 = arith.select %310, %312, %308 : vector<16x128xi1>, vector<16x128xf32>
    %cst_139 = arith.constant 1.000000e+00 : f32
    %314 = vector.broadcast %cst_139 : f32 to vector<16x128xf32>
    %315 = arith.addf %314, %313 : vector<16x128xf32>
    %316 = arith.mulf %278, %315 : vector<16x128xf32>
    %c0_140 = arith.constant 0 : index
    %c0_141 = arith.constant 0 : index
    %317 = vector.load %arg16[%c0_140, %c0_141] : memref<128x128xf32, #tpu.memory_space<vmem>>, vector<128x128xf32>
    %cst_142 = arith.constant dense<0.000000e+00> : vector<16x128xf32>
    %318 = tpu.matmul %316, %317, %cst_142 {dimension_numbers = #tpu.dot_dimension_numbers<[1], [0], [0], [1], [0, 0, 1, 1], [], []>} : vector<16x128xf32>, vector<128x128xf32>, vector<16x128xf32> -> vector<16x128xf32>
    %c0_143 = arith.constant 0 : index
    %c0_144 = arith.constant 0 : index
    %319 = vector.load %arg17[%c0_143, %c0_144] : memref<1x128xf32, #tpu.memory_space<vmem>>, vector<1x128xf32>
    %320 = vector.broadcast %319 : vector<1x128xf32> to vector<16x128xf32>
    %321 = arith.addf %318, %320 : vector<16x128xf32>
    %322 = arith.addf %186, %321 : vector<16x128xf32>
    %cst_145 = arith.constant 5.000000e-01 : f32
    %323 = vector.broadcast %cst_145 : f32 to vector<16x128xf32>
    %324 = arith.mulf %323, %322 : vector<16x128xf32>
    %cst_146 = arith.constant 0.707106769 : f32
    %325 = vector.broadcast %cst_146 : f32 to vector<16x128xf32>
    %326 = arith.mulf %322, %325 : vector<16x128xf32>
    %327 = math.absf %326 : vector<16x128xf32>
    %cst_147 = arith.constant 0.327591091 : f32
    %328 = vector.broadcast %cst_147 : f32 to vector<16x128xf32>
    %329 = arith.mulf %328, %327 : vector<16x128xf32>
    %cst_148 = arith.constant 1.000000e+00 : f32
    %330 = vector.broadcast %cst_148 : f32 to vector<16x128xf32>
    %331 = arith.addf %330, %329 : vector<16x128xf32>
    %cst_149 = arith.constant 1.000000e+00 : f32
    %332 = vector.broadcast %cst_149 : f32 to vector<16x128xf32>
    %333 = arith.divf %332, %331 : vector<16x128xf32>
    %cst_150 = arith.constant 1.06140542 : f32
    %334 = vector.broadcast %cst_150 : f32 to vector<16x128xf32>
    %335 = arith.mulf %334, %333 : vector<16x128xf32>
    %cst_151 = arith.constant -1.45315206 : f32
    %336 = vector.broadcast %cst_151 : f32 to vector<16x128xf32>
    %337 = arith.addf %335, %336 : vector<16x128xf32>
    %338 = arith.mulf %337, %333 : vector<16x128xf32>
    %cst_152 = arith.constant 1.42141378 : f32
    %339 = vector.broadcast %cst_152 : f32 to vector<16x128xf32>
    %340 = arith.addf %338, %339 : vector<16x128xf32>
    %341 = arith.mulf %340, %333 : vector<16x128xf32>
    %cst_153 = arith.constant -0.284496725 : f32
    %342 = vector.broadcast %cst_153 : f32 to vector<16x128xf32>
    %343 = arith.addf %341, %342 : vector<16x128xf32>
    %344 = arith.mulf %343, %333 : vector<16x128xf32>
    %cst_154 = arith.constant 0.254829586 : f32
    %345 = vector.broadcast %cst_154 : f32 to vector<16x128xf32>
    %346 = arith.addf %344, %345 : vector<16x128xf32>
    %347 = arith.mulf %346, %333 : vector<16x128xf32>
    %cst_155 = arith.constant 0.000000e+00 : f32
    %348 = vector.broadcast %cst_155 : f32 to vector<16x128xf32>
    %349 = arith.subf %348, %327 : vector<16x128xf32>
    %350 = arith.mulf %349, %327 : vector<16x128xf32>
    %351 = math.exp %350 : vector<16x128xf32>
    %352 = arith.mulf %347, %351 : vector<16x128xf32>
    %cst_156 = arith.constant 1.000000e+00 : f32
    %353 = vector.broadcast %cst_156 : f32 to vector<16x128xf32>
    %354 = arith.subf %353, %352 : vector<16x128xf32>
    %cst_157 = arith.constant 0.000000e+00 : f32
    %355 = vector.broadcast %cst_157 : f32 to vector<16x128xf32>
    %356 = arith.cmpf olt, %326, %355 : vector<16x128xf32>
    %cst_158 = arith.constant 0.000000e+00 : f32
    %357 = vector.broadcast %cst_158 : f32 to vector<16x128xf32>
    %358 = arith.subf %357, %354 : vector<16x128xf32>
    %359 = arith.select %356, %358, %354 : vector<16x128xi1>, vector<16x128xf32>
    %cst_159 = arith.constant 1.000000e+00 : f32
    %360 = vector.broadcast %cst_159 : f32 to vector<16x128xf32>
    %361 = arith.addf %360, %359 : vector<16x128xf32>
    %362 = arith.mulf %324, %361 : vector<16x128xf32>
    %c0_160 = arith.constant 0 : index
    %c0_161 = arith.constant 0 : index
    %363 = vector.load %arg18[%c0_160, %c0_161] : memref<128x128xf32, #tpu.memory_space<vmem>>, vector<128x128xf32>
    %cst_162 = arith.constant dense<0.000000e+00> : vector<16x128xf32>
    %364 = tpu.matmul %362, %363, %cst_162 {dimension_numbers = #tpu.dot_dimension_numbers<[1], [0], [0], [1], [0, 0, 1, 1], [], []>} : vector<16x128xf32>, vector<128x128xf32>, vector<16x128xf32> -> vector<16x128xf32>
    %c0_163 = arith.constant 0 : index
    %c0_164 = arith.constant 0 : index
    %365 = vector.load %arg19[%c0_163, %c0_164] : memref<1x128xf32, #tpu.memory_space<vmem>>, vector<1x128xf32>
    %366 = vector.broadcast %365 : vector<1x128xf32> to vector<16x128xf32>
    %367 = arith.addf %364, %366 : vector<16x128xf32>
    %c0_165 = arith.constant 0 : index
    %c0_166 = arith.constant 0 : index
    %368 = vector.load %arg20[%c0_165, %c0_166] : memref<16x128xf32, #tpu.memory_space<vmem>>, vector<16x128xf32>
    tpu.vector_store %arg20[%c0_165, %c0_166], %367 {strides = array<i32>} : memref<16x128xf32, #tpu.memory_space<vmem>>, vector<16x128xf32>,
    return
  }
  func.func @transform_0(%arg0: i32) -> (i32, i32) {
    %c0_i32 = arith.constant 0 : i32
    %c0_i32_0 = arith.constant 0 : i32
    return %arg0, %c0_i32 : i32, i32
  }
  func.func @transform_1(%arg0: i32) -> (i32, i32) {
    %c0_i32 = arith.constant 0 : i32
    %c0_i32_0 = arith.constant 0 : i32
    %c0_i32_1 = arith.constant 0 : i32
    return %c0_i32, %c0_i32_0 : i32, i32
  }
  func.func @transform_2(%arg0: i32) -> (i32, i32) {
    %c0_i32 = arith.constant 0 : i32
    %c0_i32_0 = arith.constant 0 : i32
    %c0_i32_1 = arith.constant 0 : i32
    return %c0_i32, %c0_i32_0 : i32, i32
  }
  func.func @transform_3(%arg0: i32) -> (i32, i32) {
    %c0_i32 = arith.constant 0 : i32
    %c0_i32_0 = arith.constant 0 : i32
    %c0_i32_1 = arith.constant 0 : i32
    return %c0_i32, %c0_i32_0 : i32, i32
  }
  func.func @transform_4(%arg0: i32) -> (i32, i32) {
    %c0_i32 = arith.constant 0 : i32
    %c0_i32_0 = arith.constant 0 : i32
    %c0_i32_1 = arith.constant 0 : i32
    return %c0_i32, %c0_i32_0 : i32, i32
  }
  func.func @transform_5(%arg0: i32) -> (i32, i32) {
    %c0_i32 = arith.constant 0 : i32
    %c0_i32_0 = arith.constant 0 : i32
    %c0_i32_1 = arith.constant 0 : i32
    return %c0_i32, %c0_i32_0 : i32, i32
  }
  func.func @transform_6(%arg0: i32) -> (i32, i32) {
    %c0_i32 = arith.constant 0 : i32
    %c0_i32_0 = arith.constant 0 : i32
    %c0_i32_1 = arith.constant 0 : i32
    return %c0_i32, %c0_i32_0 : i32, i32
  }
  func.func @transform_7(%arg0: i32) -> (i32, i32) {
    %c0_i32 = arith.constant 0 : i32
    %c0_i32_0 = arith.constant 0 : i32
    %c0_i32_1 = arith.constant 0 : i32
    return %c0_i32, %c0_i32_0 : i32, i32
  }
  func.func @transform_8(%arg0: i32) -> (i32, i32) {
    %c0_i32 = arith.constant 0 : i32
    %c0_i32_0 = arith.constant 0 : i32
    %c0_i32_1 = arith.constant 0 : i32
    return %c0_i32, %c0_i32_0 : i32, i32
  }
  func.func @transform_9(%arg0: i32) -> (i32, i32) {
    %c0_i32 = arith.constant 0 : i32
    %c0_i32_0 = arith.constant 0 : i32
    %c0_i32_1 = arith.constant 0 : i32
    return %c0_i32, %c0_i32_0 : i32, i32
  }
  func.func @transform_10(%arg0: i32) -> (i32, i32) {
    %c0_i32 = arith.constant 0 : i32
    %c0_i32_0 = arith.constant 0 : i32
    %c0_i32_1 = arith.constant 0 : i32
    return %c0_i32, %c0_i32_0 : i32, i32
  }
  func.func @transform_11(%arg0: i32) -> (i32, i32) {
    %c0_i32 = arith.constant 0 : i32
    %c0_i32_0 = arith.constant 0 : i32
    %c0_i32_1 = arith.constant 0 : i32
    return %c0_i32, %c0_i32_0 : i32, i32
  }
  func.func @transform_12(%arg0: i32) -> (i32, i32) {
    %c0_i32 = arith.constant 0 : i32
    %c0_i32_0 = arith.constant 0 : i32
    %c0_i32_1 = arith.constant 0 : i32
    return %c0_i32, %c0_i32_0 : i32, i32
  }
  func.func @transform_13(%arg0: i32) -> (i32, i32) {
    %c0_i32 = arith.constant 0 : i32
    %c0_i32_0 = arith.constant 0 : i32
    %c0_i32_1 = arith.constant 0 : i32
    return %c0_i32, %c0_i32_0 : i32, i32
  }
  func.func @transform_14(%arg0: i32) -> (i32, i32) {
    %c0_i32 = arith.constant 0 : i32
    %c0_i32_0 = arith.constant 0 : i32
    %c0_i32_1 = arith.constant 0 : i32
    return %c0_i32, %c0_i32_0 : i32, i32
  }
  func.func @transform_15(%arg0: i32) -> (i32, i32) {
    %c0_i32 = arith.constant 0 : i32
    %c0_i32_0 = arith.constant 0 : i32
    %c0_i32_1 = arith.constant 0 : i32
    return %c0_i32, %c0_i32_0 : i32, i32
  }
  func.func @transform_16(%arg0: i32) -> (i32, i32) {
    %c0_i32 = arith.constant 0 : i32
    %c0_i32_0 = arith.constant 0 : i32
    %c0_i32_1 = arith.constant 0 : i32
    return %c0_i32, %c0_i32_0 : i32, i32
  }
  func.func @transform_17(%arg0: i32) -> (i32, i32) {
    %c0_i32 = arith.constant 0 : i32
    %c0_i32_0 = arith.constant 0 : i32
    %c0_i32_1 = arith.constant 0 : i32
    return %c0_i32, %c0_i32_0 : i32, i32
  }
  func.func @transform_18(%arg0: i32) -> (i32, i32) {
    %c0_i32 = arith.constant 0 : i32
    %c0_i32_0 = arith.constant 0 : i32
    %c0_i32_1 = arith.constant 0 : i32
    return %c0_i32, %c0_i32_0 : i32, i32
  }
  func.func @transform_19(%arg0: i32) -> (i32, i32) {
    %c0_i32 = arith.constant 0 : i32
    %c0_i32_0 = arith.constant 0 : i32
    return %arg0, %c0_i32 : i32, i32
  }
}

</mosaic_0001>

<bundles_post_ra>
// kernel: tpu_custom_call.1
= control target key start
LH: loop header
LB: loop body
LE: loop exit
PB: predicated region body
PF: predicated region fallthrough
CT: control target
= control target key end

     0   :  { %s2006_s0 = inlined_call_operand.hbm [shape: f32[16,128], index: 0, kind: input, shape index: {}]   ;;  %s2007_s1 = inlined_call_operand.hbm [shape: f32[128,128], index: 1, kind: input, shape index: {}]   ;;  %s2008_s2 = inlined_call_operand.vmem [shape: f32[1,128], index: 2, kind: input, shape index: {}]   ;;  %s2009_s3 = inlined_call_operand.hbm [shape: f32[128,128], index: 3, kind: input, shape index: {}]   ;;  %s2010_s4 = inlined_call_operand.vmem [shape: f32[1,128], index: 4, kind: input, shape index: {}]   ;;  %s2011_s5 = inlined_call_operand.hbm [shape: f32[128,128], index: 5, kind: input, shape index: {}]   ;;  %s2012_s6 = inlined_call_operand.vmem [shape: f32[1,128], index: 6, kind: input, shape index: {}]   ;;  %s2013_s7 = inlined_call_operand.hbm [shape: f32[128,128], index: 7, kind: input, shape index: {}]   ;;  %s2014_s8 = inlined_call_operand.vmem [shape: f32[1,128], index: 8, kind: input, shape index: {}]   ;;  %s2015_s9 = inlined_call_operand.hbm [shape: f32[128,128], index: 9, kind: input, shape index: {}]   ;;  %s2016_s10 = inlined_call_operand.vmem [shape: f32[1,128], index: 10, kind: input, shape index: {}]   ;;  %s2017_s11 = inlined_call_operand.hbm [shape: f32[128,128], index: 11, kind: input, shape index: {}]   ;;  %s2018_s12 = inlined_call_operand.vmem [shape: f32[1,128], index: 12, kind: input, shape index: {}]   ;;  %s2019_s13 = inlined_call_operand.hbm [shape: f32[128,128], index: 13, kind: input, shape index: {}]   ;;  %s2020_s14 = inlined_call_operand.vmem [shape: f32[1,128], index: 14, kind: input, shape index: {}]   ;;  %s2021_s15 = inlined_call_operand.hbm [shape: f32[128,128], index: 15, kind: input, shape index: {}]   ;;  %s2022_s16 = inlined_call_operand.vmem [shape: f32[1,128], index: 16, kind: input, shape index: {}]   ;;  %s2023_s17 = inlined_call_operand.hbm [shape: f32[128,128], index: 17, kind: input, shape index: {}]   ;;  %s2024_s18 = inlined_call_operand.vmem [shape: f32[1,128], index: 18, kind: input, shape index: {}]   ;;  %s2025_s19 = inlined_call_operand.hbm [shape: f32[16,128], index: 19, kind: output, shape index: {}]  }
   0x1   :  { %2026 = sst [smem:[#allocation27_spill]] %s2006_s0 }
   0x2   :  { %2027 = sst [smem:[#allocation28_spill]] %s2007_s1 }
   0x3   :  { %2028 = sst [smem:[#allocation29_spill]] %s2008_s2 }
   0x4   :  { %2029 = sst [smem:[#allocation30_spill]] %s2009_s3 }
   0x5   :  { %24 = vsyncpa [#allocation3], 0 }
   0x6   :  { %25 = vsyncpa [#allocation6], 0 }
   0x7   :  { %26 = vsyncpa [#allocation9], 0 }
   0x8   :  { %27 = vsyncpa [#allocation12], 0 }
   0x9   :  { %28 = vsyncpa [#allocation15], 0 }
   0xa   :  { %29 = vsyncpa [#allocation18], 0 }
   0xb   :  { %30 = vsyncpa [#allocation4], 0  ;;  %s2030_s20 = sld [smem:[#allocation28_spill]]  ;;  %s1658_s1 = smov [#allocation5]  }
   0xc   :  { %s50_s22 = sshll.u32 %s1658_s1, 4  ;;  %s78_s24 = sshll.u32 %s2011_s5, 4  ;;  %s51_s22 = int_to_ptr.vmem [resolvable:$true] %s50_s22  ;;  %s79_s24 = int_to_ptr.hbm [resolvable:$true] %s78_s24 }
   0xd   :  { %s1659_s25 = smov 128   ;;  %s1660_s3 = smov 8  }
   0xe   :  { %s1661_s26 = smov [#allocation8]   ;;  %s108_s0 = sshll.u32 %s2015_s9, 4  ;;  %s109_s0 = int_to_ptr.hbm [resolvable:$true] %s108_s0 }
   0xf   :  { %s80_s27 = sshll.u32 %s1661_s26, 4  ;;  %s1662_s1 = smov [#allocation11]   ;;  %s81_s27 = int_to_ptr.vmem [resolvable:$true] %s80_s27 }
  0x10   :  { %86 = dma.hbm_to_vmem [thread:$0]  %s79_s24, 2048, %s81_s27, [#allocation9], %s1659_s25, %s1659_s25, %s1660_s3  }
  0x11   :  { %s48_s21 = sshll.u32 %s2030_s20, 4  ;;  %s138_s20 = sshll.u32 %s2019_s13, 4  ;;  %s49_s21 = int_to_ptr.hbm [resolvable:$true] %s48_s21  ;;  %s139_s20 = int_to_ptr.hbm [resolvable:$true] %s138_s20 }
  0x12   :  { %56 = dma.hbm_to_vmem [thread:$0]  %s49_s21, 2048, %s51_s22, [#allocation6], %s1659_s25, %s1659_s25, %s1660_s3  }
  0x13   :  { %s110_s2 = sshll.u32 %s1662_s1, 4  ;;  %s1663_s21 = smov [#allocation14]   ;;  %s111_s2 = int_to_ptr.vmem [resolvable:$true] %s110_s2 }
  0x14   :  { %116 = dma.hbm_to_vmem [thread:$0]  %s109_s0, 2048, %s111_s2, [#allocation12], %s1659_s25, %s1659_s25, %s1660_s3  }
  0x15   :  { %s140_s9 = sshll.u32 %s1663_s21, 4  ;;  %s2031_s26 = sld [smem:[#allocation27_spill]]  ;;  %s141_s9 = int_to_ptr.vmem [resolvable:$true] %s140_s9 }
  0x16   :  { %146 = dma.hbm_to_vmem [thread:$0]  %s139_s20, 2048, %s141_s9, [#allocation15], %s1659_s25, %s1659_s25, %s1660_s3  }
  0x17   :  { %s2032_s27 = sld [smem:[#allocation30_spill]]  ;;  %s1664_s5 = smov [#allocation2]  }
  0x18   :  { %s37_s30 = sshll.u32 %s1664_s5, 4  ;;  %s1665_s0 = smov [#allocation7]   ;;  %s38_s30 = int_to_ptr.vmem [resolvable:$true] %s37_s30 }
  0x19   :  { %s65_s1 = sshll.u32 %s1665_s0, 4  ;;  %s93_s22 = sshll.u32 %s2013_s7, 4  ;;  %s66_s1 = int_to_ptr.vmem [resolvable:$true] %s65_s1  ;;  %s94_s22 = int_to_ptr.hbm [resolvable:$true] %s93_s22 }
  0x1a   :  { %s123_s23 = sshll.u32 %s2017_s11, 4  ;;  %s153_s5 = sshll.u32 %s2021_s15, 4  ;;  %s124_s23 = int_to_ptr.hbm [resolvable:$true] %s123_s23  ;;  %s154_s5 = int_to_ptr.hbm [resolvable:$true] %s153_s5 }
  0x1b   :  { %s35_s28 = sshll.u32 %s2031_s26, 4  ;;  %s1666_s26 = smov [#allocation10]   ;;  %s36_s28 = int_to_ptr.hbm [resolvable:$true] %s35_s28 }
  0x1c   :  { %43 = dma.hbm_to_vmem [thread:$0]  %s36_s28, 256, %s38_s30, [#allocation3], %s1659_s25, %s1659_s25, %s1660_s3  }
  0x1d   :  { %s63_s29 = sshll.u32 %s2032_s27, 4  ;;  %s95_s13 = sshll.u32 %s1666_s26, 4  ;;  %s64_s29 = int_to_ptr.hbm [resolvable:$true] %s63_s29  ;;  %s96_s13 = int_to_ptr.vmem [resolvable:$true] %s95_s13 }
  0x1e   :  { %71 = dma.hbm_to_vmem [thread:$0]  %s64_s29, 2048, %s66_s1, [#allocation6], %s1659_s25, %s1659_s25, %s1660_s3  }
  0x1f   :  { %101 = dma.hbm_to_vmem [thread:$0]  %s94_s22, 2048, %s96_s13, [#allocation9], %s1659_s25, %s1659_s25, %s1660_s3  }
  0x20   :  { %s1667_s28 = smov [#allocation13]   ;;  %s168_s30 = sshll.u32 %s2023_s17, 4  ;;  %s169_s30 = int_to_ptr.hbm [resolvable:$true] %s168_s30 }
  0x21   :  { %s125_s7 = sshll.u32 %s1667_s28, 4  ;;  %s1668_s0 = smov [#allocation16]   ;;  %s126_s7 = int_to_ptr.vmem [resolvable:$true] %s125_s7 }
  0x22   :  { %131 = dma.hbm_to_vmem [thread:$0]  %s124_s23, 2048, %s126_s7, [#allocation12], %s1659_s25, %s1659_s25, %s1660_s3  }
  0x23   :  { %s155_s1 = sshll.u32 %s1668_s0, 4  ;;  %s1669_s2 = smov [#allocation17]   ;;  %s156_s1 = int_to_ptr.vmem [resolvable:$true] %s155_s1 }
  0x24   :  { %161 = dma.hbm_to_vmem [thread:$0]  %s154_s5, 2048, %s156_s1, [#allocation15], %s1659_s25, %s1659_s25, %s1660_s3  }
  0x25   :  { %s170_s15 = sshll.u32 %s1669_s2, 4  ;;  %s171_s15 = int_to_ptr.vmem [resolvable:$true] %s170_s15 }
  0x26   :  { %176 = dma.hbm_to_vmem [thread:$0]  %s169_s30, 2048, %s171_s15, [#allocation18], %s1659_s25, %s1659_s25, %s1660_s3  }
  0x27   :  { %1644 = dma.done.wait [#allocation3], 256  }
  0x28   :  { %1645 = vsyncadd [#allocation3], 4294967040 }
  0x29   :  { %1646 = dma.done.wait [#allocation6], 4096  }
  0x2a   :  { %1647 = vsyncadd [#allocation6], 4294963200 }
  0x2b   :  { %1648 = dma.done.wait [#allocation9], 4096  }
  0x2c   :  { %1649 = vsyncadd [#allocation9], 4294963200 }
  0x2d   :  { %1650 = dma.done.wait [#allocation12], 4096  }
  0x2e   :  { %1651 = vsyncadd [#allocation12], 4294963200 }
  0x2f   :  { %1652 = dma.done.wait [#allocation15], 4096  }
  0x30   :  { %1653 = vsyncadd [#allocation15], 4294963200 }
  0x31   :  { %1654 = dma.done.wait [#allocation18], 2048  }
  0x32   :  { %1655 = vsyncadd [#allocation18], 4294965248  ;;  %v236_v0 = vld [vmem:[#allocation5 + $0x78] sm:$0xff]  ;;  %v235_v1 = vld [vmem:[#allocation5 + $0x70] sm:$0xff]  ;;  %s2033_s22 = sld [smem:[#allocation29_spill]]  ;;  %s1670_s5 = smov [#allocation19]  }
  0x33   :  { %241 = vmatpush.msra.mxu0 %v236_v0  ;;  %v234_v2 = vld [vmem:[#allocation5 + $0x68] sm:$0xff]  ;;  %v233_v3 = vld [vmem:[#allocation5 + $0x60] sm:$0xff]  ;;  %v232_v4 = vld [vmem:[#allocation5 + $0x58] sm:$0xff]  ;;  %s1258_s11 = sshll.u32 %s1670_s5, 4  ;;  %s1260_s0 = sshll.u32 %s2025_s19, 4  ;;  %s1259_s11 = int_to_ptr.vmem [resolvable:$true] %s1258_s11  ;;  %s1261_s0 = int_to_ptr.hbm [resolvable:$true] %s1260_s0 }
  0x34   :  { %v231_v5 = vld [vmem:[#allocation5 + $0x50] sm:$0xff]  ;;  %v230_v6 = vld [vmem:[#allocation5 + $0x48] sm:$0xff]  ;;  %v229_v7 = vld [vmem:[#allocation5 + $0x40] sm:$0xff] }
  0x35   :  { %242 = vmatpush.msra.mxu0 %v235_v1  ;;  %v228_v8 = vld [vmem:[#allocation5 + $0x38] sm:$0xff]  ;;  %v227_v9 = vld [vmem:[#allocation5 + $0x30] sm:$0xff]  ;;  %v226_v10 = vld [vmem:[#allocation5 + $0x28] sm:$0xff] }
  0x36   :  { %v225_v11 = vld [vmem:[#allocation5 + $0x20] sm:$0xff]  ;;  %v224_v12 = vld [vmem:[#allocation5 + $0x18] sm:$0xff]  ;;  %v223_v13 = vld [vmem:[#allocation5 + $0x10] sm:$0xff] }
  0x37   :  { %243 = vmatpush.msra.mxu0 %v234_v2  ;;  %v222_v14 = vld [vmem:[#allocation5 + $0x8] sm:$0xff]  ;;  %v221_v15 = vld [vmem:[#allocation5] sm:$0xff]  ;;  %v219_v16 = vld [vmem:[#allocation2] sm:$0xff] }
  0x38   :  { %v220_v17 = vld [vmem:[#allocation2 + $0x8] sm:$0xff]  ;;  %v358_v19 = vld [vmem:[#allocation7 + $0x70] sm:$0xff]  ;;  %v357_v20 = vld [vmem:[#allocation7 + $0x68] sm:$0xff] }
  0x39   :  { %244 = vmatpush.msra.mxu0 %v233_v3  ;;  %v359_v18 = vld [vmem:[#allocation7 + $0x78] sm:$0xff]  ;;  %v1307_v21 = vld [vmem:[%s2033_s22] ss:$0 sm:$0xff]  ;;  %v356_v22 = vld [vmem:[#allocation7 + $0x60] sm:$0xff] }
  0x3a   :  { %364 = vmatpush.msra.mxu1 %v359_v18  ;;  %v355_v23 = vld [vmem:[#allocation7 + $0x58] sm:$0xff]  ;;  %v354_v26 = vld [vmem:[#allocation7 + $0x50] sm:$0xff]  ;;  %v353_v28 = vld [vmem:[#allocation7 + $0x48] sm:$0xff] }
  0x3b   :  { %245 = vmatpush.msra.mxu0 %v232_v4  ;;  %v352_v30 = vld [vmem:[#allocation7 + $0x40] sm:$0xff]  ;;  %v351_v32 = vld [vmem:[#allocation7 + $0x38] sm:$0xff]  ;;  %v350_v36 = vld [vmem:[#allocation7 + $0x30] sm:$0xff] }
  0x3c   :  { %365 = vmatpush.msra.mxu1 %v358_v19  ;;  %v349_v38 = vld [vmem:[#allocation7 + $0x28] sm:$0xff]  ;;  %v348_v40 = vld [vmem:[#allocation7 + $0x20] sm:$0xff]  ;;  %v347_v42 = vld [vmem:[#allocation7 + $0x18] sm:$0xff] }
  0x3d   :  { %246 = vmatpush.msra.mxu0 %v231_v5  ;;  %v346_v45 = vld [vmem:[#allocation7 + $0x10] sm:$0xff]  ;;  %v345_v47 = vld [vmem:[#allocation7 + $0x8] sm:$0xff]  ;;  %v344_v49 = vld [vmem:[#allocation7] sm:$0xff] }
  0x3e   :  { %366 = vmatpush.msra.mxu1 %v357_v20 }
  0x3f   :  { %247 = vmatpush.msra.mxu0 %v230_v6 }
  0x40   :  { %367 = vmatpush.msra.mxu1 %v356_v22 }
  0x41   :  { %248 = vmatpush.msra.mxu0 %v229_v7 }
  0x42   :  { %368 = vmatpush.msra.mxu1 %v355_v23 }
  0x43   :  { %249 = vmatpush.msra.mxu0 %v228_v8 }
  0x44   :  { %369 = vmatpush.msra.mxu1 %v354_v26 }
  0x45   :  { %250 = vmatpush.msra.mxu0 %v227_v9 }
  0x46   :  { %370 = vmatpush.msra.mxu1 %v353_v28 }
  0x47   :  { %251 = vmatpush.msra.mxu0 %v226_v10 }
  0x48   :  { %371 = vmatpush.msra.mxu1 %v352_v30 }
  0x49   :  { %252 = vmatpush.msra.mxu0 %v225_v11 }
  0x4a   :  { %372 = vmatpush.msra.mxu1 %v351_v32 }
  0x4b   :  { %253 = vmatpush.msra.mxu0 %v224_v12 }
  0x4c   :  { %373 = vmatpush.msra.mxu1 %v350_v36 }
  0x4d   :  { %254 = vmatpush.msra.mxu0 %v223_v13 }
  0x4e   :  { %374 = vmatpush.msra.mxu1 %v349_v38 }
  0x4f   :  { %255 = vmatpush.msra.mxu0 %v222_v14 }
  0x50   :  { %375 = vmatpush.msra.mxu1 %v348_v40 }
  0x51   :  { %256 = vmatpush.msra.mxu0 %v221_v15 }
  0x52   :  { %257 = vmatmul.f32.vlgmr.msra.gmra.mxu0 %v219_v16  ;;  %376 = vmatpush.msra.mxu1 %v347_v42 }
  0x54   :  { %377 = vmatpush.msra.mxu1 %v346_v45 }
  0x56   :  { %378 = vmatpush.msra.mxu1 %v345_v47  ;;  %v481_v47 = vld [vmem:[#allocation8 + $0x70] sm:$0xff] }
  0x58   :  { %379 = vmatpush.msra.mxu1 %v344_v49  ;;  %v480_v49 = vld [vmem:[#allocation8 + $0x68] sm:$0xff] }
  0x5a   :  { %260 = vmatmul.f32.gmra.mxu0 %v220_v17 }
  0xcf   :  { %v258_v24 = vpop.f32.mrf.mxu0 }
  0xd0   :  { %v1834_v25 = vadd.f32 %v1307_v21, %v258_v24 }
  0xd2   :  { %v1837_v27 = vmul.f32 0.70710677, %v1834_v25  ;;  %v264_v36 = vmul.f32 0.5, %v1834_v25 }
  0xd4   :  { %v268_v29 = vand.u32 2147483647, %v1837_v27  ;;  %vm334_vm8 = vcmp.lt.f32.partialorder %v1837_v27, 0.0  ;;  %v482_v27 = vld [vmem:[#allocation8 + $0x78] sm:$0xff] }
  0xd5   :  { %487 = vmatpush.msra.mxu2 %v482_v27 }
  0xd6   :  { %v270_v31 = vmul.f32 0.3275911, %v268_v29  ;;  %v322_v58 = vsub.f32 0.0, %v268_v29 }
  0xd7   :  { %v261_v33 = vpop.f32.mrf.mxu0  ;;  %488 = vmatpush.msra.mxu2 %v481_v47 }
  0xd8   :  { %v272_v34 = vadd.f32 1.0, %v270_v31  ;;  %v1840_v35 = vadd.f32 %v1307_v21, %v261_v33  ;;  %v324_v2 = vmul.f32 %v322_v58, %v268_v29 }
  0xd9   :  { %489 = vmatpush.msra.mxu2 %v480_v49 }
  0xda   :  { %1316 = vrcp.f32 %v272_v34  ;;  %v1843_v37 = vmul.f32 0.70710677, %v1840_v35  ;;  %v285_v50 = vand.u32 2147483648, %v272_v34  ;;  %v283_v52 = vand.u32 2147483647, %v272_v34 }
  0xdb   :  { %vm279_vm1 = vweird.f32 %v272_v34  ;;  %v326_v8 = vmul.f32 1.442695, %v324_v2 }
  0xdc   :  { %v269_v39 = vand.u32 2147483647, %v1843_v37  ;;  %v286_v55 = vor.u32 1.1754944e-38, %v285_v50  ;;  %vm284_vm3 = vcmp.eq.f32.partialorder %v283_v52, 8.507059e+37  ;;  %vm335_vm9 = vcmp.lt.f32.partialorder %v1843_v37, 0.0  ;;  %v479_v50 = vld [vmem:[#allocation8 + $0x60] sm:$0xff] }
  0xdd   :  { %v478_v52 = vld [vmem:[#allocation8 + $0x58] sm:$0xff]  ;;  %490 = vmatpush.msra.mxu2 %v479_v50 }
  0xde   :  { %v271_v41 = vmul.f32 0.3275911, %v269_v39  ;;  %v323_v9 = vsub.f32 0.0, %v269_v39 }
  0xdf   :  { %491 = vmatpush.msra.mxu2 %v478_v52 }
  0xe0   :  { %v1317_v43 = vpop.eup %1316  ;;  %v273_v44 = vadd.f32 1.0, %v271_v41  ;;  %v325_v15 = vmul.f32 %v323_v9, %v269_v39  ;;  %v469_v9 = vld [vmem:[#allocation8 + $0x10] sm:$0xff] }
  0xe1   :  { %v275_v46 = vmul.f32 %v1317_v43, %v272_v34  ;;  %vm280_vm0 = vweird.f32 %v1317_v43 }
  0xe2   :  { %1318 = vrcp.f32 %v273_v44  ;;  %vm281_vm2 = vmor %vm279_vm1, %vm280_vm0  ;;  %v300_v62 = vand.u32 2147483648, %v273_v44  ;;  %v298_v1 = vand.u32 2147483647, %v273_v44  ;;  %vm294_vm5 = vweird.f32 %v273_v44 }
  0xe3   :  { %v276_v48 = vsub.f32 1.0, %v275_v46  ;;  %1320 = vpow2.f32 %v326_v8  ;;  %v328_v20 = vmul.f32 1.442695, %v325_v15 }
  0xe4   :  { %v301_v5 = vor.u32 1.1754944e-38, %v300_v62  ;;  %vm299_vm7 = vcmp.eq.f32.partialorder %v298_v1, 8.507059e+37  ;;  %v472_v1 = vld [vmem:[#allocation8 + $0x28] sm:$0xff] }
  0xe5   :  { %v277_v51 = vmul.f32 %v1317_v43, %v276_v48  ;;  %1322 = vpow2.f32 %v328_v20  ;;  %v1308_v48 = vld [vmem:[%s2010_s4] ss:$0 sm:$0xff] }
  0xe7   :  { %v278_v53 = vadd.f32 %v1317_v43, %v277_v51 }
  0xe8   :  { %v1319_v54 = vpop.eup %1318 }
  0xe9   :  { %v290_v56 = vmul.f32 %v1319_v54, %v273_v44  ;;  %v282_v57 = vsel %vm281_vm2, %v1317_v43, %v278_v53  ;;  %vm295_vm4 = vweird.f32 %v1319_v54  ;;  %v1321_v23 = vpop.eup %1320  ;;  %v265_v44 = vmul.f32 0.5, %v1840_v35  ;;  %v477_v53 = vld [vmem:[#allocation8 + $0x50] sm:$0xff] }
  0xea   :  { %v287_v59 = vsel %vm284_vm3, %v286_v55, %v282_v57  ;;  %vm296_vm6 = vmor %vm294_vm5, %vm295_vm4  ;;  %v476_v55 = vld [vmem:[#allocation8 + $0x48] sm:$0xff]  ;;  %492 = vmatpush.msra.mxu2 %v477_v53  ;;  %v475_v57 = vld [vmem:[#allocation8 + $0x40] sm:$0xff] }
  0xeb   :  { %v291_v60 = vsub.f32 1.0, %v290_v56  ;;  %v304_v61 = vmul.f32 1.0614054, %v287_v59  ;;  %v1323_v34 = vpop.eup %1322 }
  0xec   :  { %493 = vmatpush.msra.mxu2 %v476_v55 }
  0xed   :  { %v306_v63 = vadd.f32 -1.4531521, %v304_v61  ;;  %v292_v0 = vmul.f32 %v1319_v54, %v291_v60  ;;  %v474_v60 = vld [vmem:[#allocation8 + $0x38] sm:$0xff] }
  0xee   :  { %494 = vmatpush.msra.mxu2 %v475_v57 }
  0xef   :  { %v308_v3 = vmul.f32 %v306_v63, %v287_v59  ;;  %v293_v4 = vadd.f32 %v1319_v54, %v292_v0  ;;  %v473_v63 = vld [vmem:[#allocation8 + $0x30] sm:$0xff] }
  0xf0   :  { %495 = vmatpush.msra.mxu2 %v474_v60 }
  0xf1   :  { %v310_v6 = vadd.f32 1.4214138, %v308_v3  ;;  %v297_v7 = vsel %vm296_vm6, %v1319_v54, %v293_v4  ;;  %v471_v3 = vld [vmem:[#allocation8 + $0x20] sm:$0xff] }
  0xf2   :  { %v302_v10 = vsel %vm299_vm7, %v301_v5, %v297_v7  ;;  %496 = vmatpush.msra.mxu2 %v473_v63  ;;  %v470_v5 = vld [vmem:[#allocation8 + $0x18] sm:$0xff] }
  0xf3   :  { %v312_v11 = vmul.f32 %v310_v6, %v287_v59  ;;  %v305_v12 = vmul.f32 1.0614054, %v302_v10 }
  0xf4   :  { %497 = vmatpush.msra.mxu2 %v472_v1 }
  0xf5   :  { %v314_v13 = vadd.f32 -0.28449672, %v312_v11  ;;  %v307_v14 = vadd.f32 -1.4531521, %v305_v12  ;;  %v468_v11 = vld [vmem:[#allocation8 + $0x8] sm:$0xff] }
  0xf6   :  { %498 = vmatpush.msra.mxu2 %v471_v3 }
  0xf7   :  { %v316_v16 = vmul.f32 %v314_v13, %v287_v59  ;;  %v309_v17 = vmul.f32 %v307_v14, %v302_v10  ;;  %v467_v14 = vld [vmem:[#allocation8] sm:$0xff] }
  0xf8   :  { %499 = vmatpush.msra.mxu2 %v470_v5 }
  0xf9   :  { %v318_v18 = vadd.f32 0.2548296, %v316_v16  ;;  %v311_v19 = vadd.f32 1.4214138, %v309_v17 }
  0xfa   :  { %500 = vmatpush.msra.mxu2 %v469_v9 }
  0xfb   :  { %v320_v21 = vmul.f32 %v318_v18, %v287_v59  ;;  %v313_v22 = vmul.f32 %v311_v19, %v302_v10 }
  0xfc   :  { %501 = vmatpush.msra.mxu2 %v468_v11 }
  0xfd   :  { %v330_v24 = vmul.f32 %v1321_v23, %v320_v21  ;;  %v315_v26 = vadd.f32 -0.28449672, %v313_v22 }
  0xfe   :  { %502 = vmatpush.msra.mxu2 %v467_v14  ;;  %v602_v14 = vld [vmem:[#allocation10 + $0x60] sm:$0xff] }
  0xff   :  { %v332_v28 = vsub.f32 1.0, %v330_v24  ;;  %v317_v29 = vmul.f32 %v315_v26, %v302_v10 }
 0x101   :  { %v336_v30 = vsub.f32 0.0, %v332_v28  ;;  %v319_v31 = vadd.f32 0.2548296, %v317_v29 }
 0x103   :  { %v338_v32 = vsel %vm334_vm8, %v336_v30, %v332_v28  ;;  %v321_v33 = vmul.f32 %v319_v31, %v302_v10 }
 0x104   :  { %v340_v38 = vadd.f32 1.0, %v338_v32 }
 0x105   :  { %v331_v39 = vmul.f32 %v1323_v34, %v321_v33 }
 0x106   :  { %v342_v40 = vmul.f32 %v340_v38, %v264_v36 }
 0x107   :  { %v333_v41 = vsub.f32 1.0, %v331_v39 }
 0x108   :  { %380 = vmatmul.f32.vlgmr.msra.gmra.mxu1 %v342_v40 }
 0x109   :  { %v337_v42 = vsub.f32 0.0, %v333_v41 }
 0x10b   :  { %v339_v43 = vsel %vm335_vm9, %v337_v42, %v333_v41 }
 0x10c   :  { %v341_v45 = vadd.f32 1.0, %v339_v43 }
 0x10e   :  { %v343_v46 = vmul.f32 %v341_v45, %v265_v44 }
 0x110   :  { %383 = vmatmul.f32.gmra.mxu1 %v343_v46 }
 0x185   :  { %v381_v51 = vpop.f32.mrf.mxu1 }
 0x186   :  { %v1853_v37 = vadd.f32 %v1308_v48, %v381_v51 }
 0x188   :  { %v1856_v54 = vmul.f32 0.70710677, %v1853_v37  ;;  %v387_v63 = vmul.f32 0.5, %v1853_v37  ;;  %v1309_v37 = vld [vmem:[%s2012_s6] ss:$0 sm:$0xff] }
 0x18a   :  { %v391_v56 = vand.u32 2147483647, %v1856_v54  ;;  %vm457_vm2 = vcmp.lt.f32.partialorder %v1856_v54, 0.0  ;;  %v605_v54 = vld [vmem:[#allocation10 + $0x78] sm:$0xff] }
 0x18b   :  { %610 = vmatpush.msra.mxu3 %v605_v54 }
 0x18c   :  { %v393_v58 = vmul.f32 0.3275911, %v391_v56  ;;  %v445_v20 = vsub.f32 0.0, %v391_v56 }
 0x18d   :  { %v384_v59 = vpop.f32.mrf.mxu1 }
 0x18e   :  { %v395_v61 = vadd.f32 1.0, %v393_v58  ;;  %v1859_v62 = vadd.f32 %v1308_v48, %v384_v59  ;;  %v447_v29 = vmul.f32 %v445_v20, %v391_v56 }
 0x190   :  { %1324 = vrcp.f32 %v395_v61  ;;  %v1862_v0 = vmul.f32 0.70710677, %v1859_v62  ;;  %v408_v12 = vand.u32 2147483648, %v395_v61  ;;  %v406_v15 = vand.u32 2147483647, %v395_v61 }
 0x191   :  { %vm402_vm11 = vweird.f32 %v395_v61  ;;  %v449_v38 = vmul.f32 1.442695, %v447_v29  ;;  %v388_v9 = vmul.f32 0.5, %v1859_v62 }
 0x192   :  { %v392_v2 = vand.u32 2147483647, %v1862_v0  ;;  %v409_v17 = vor.u32 1.1754944e-38, %v408_v12  ;;  %vm407_vm13 = vcmp.eq.f32.partialorder %v406_v15, 8.507059e+37  ;;  %vm458_vm3 = vcmp.lt.f32.partialorder %v1862_v0, 0.0  ;;  %v604_v12 = vld [vmem:[#allocation10 + $0x70] sm:$0xff] }
 0x193   :  { %611 = vmatpush.msra.mxu3 %v604_v12  ;;  %v601_v0 = vld [vmem:[#allocation10 + $0x58] sm:$0xff] }
 0x194   :  { %v394_v4 = vmul.f32 0.3275911, %v392_v2  ;;  %v446_v40 = vsub.f32 0.0, %v392_v2 }
 0x196   :  { %v1325_v6 = vpop.eup %1324  ;;  %v396_v8 = vadd.f32 1.0, %v394_v4  ;;  %v448_v46 = vmul.f32 %v446_v40, %v392_v2  ;;  %v592_v40 = vld [vmem:[#allocation10 + $0x10] sm:$0xff] }
 0x197   :  { %v398_v7 = vmul.f32 %v1325_v6, %v395_v61  ;;  %vm403_vm10 = vweird.f32 %v1325_v6 }
 0x198   :  { %1326 = vrcp.f32 %v396_v8  ;;  %vm404_vm12 = vmor %vm402_vm11, %vm403_vm10  ;;  %v423_v28 = vand.u32 2147483648, %v396_v8  ;;  %v421_v31 = vand.u32 2147483647, %v396_v8  ;;  %vm417_vm15 = vweird.f32 %v396_v8 }
 0x199   :  { %v399_v10 = vsub.f32 1.0, %v398_v7  ;;  %1328 = vpow2.f32 %v449_v38  ;;  %v451_v50 = vmul.f32 1.442695, %v448_v46  ;;  %v590_v46 = vld [vmem:[#allocation10] sm:$0xff] }
 0x19a   :  { %v424_v36 = vor.u32 1.1754944e-38, %v423_v28  ;;  %vm422_vm1 = vcmp.eq.f32.partialorder %v421_v31, 8.507059e+37  ;;  %v596_v28 = vld [vmem:[#allocation10 + $0x30] sm:$0xff] }
 0x19b   :  { %v400_v13 = vmul.f32 %v1325_v6, %v399_v10  ;;  %1330 = vpow2.f32 %v451_v50 }
 0x19d   :  { %v401_v16 = vadd.f32 %v1325_v6, %v400_v13  ;;  %v603_v13 = vld [vmem:[#allocation10 + $0x68] sm:$0xff] }
 0x19e   :  { %v1327_v18 = vpop.eup %1326  ;;  %612 = vmatpush.msra.mxu3 %v603_v13 }
 0x19f   :  { %v405_v19 = vsel %vm404_vm12, %v1325_v6, %v401_v16  ;;  %v413_v21 = vmul.f32 %v1327_v18, %v396_v8  ;;  %vm418_vm14 = vweird.f32 %v1327_v18  ;;  %v1329_v52 = vpop.eup %1328 }
 0x1a0   :  { %v410_v22 = vsel %vm407_vm13, %v409_v17, %v405_v19  ;;  %vm419_vm0 = vmor %vm417_vm15, %vm418_vm14  ;;  %613 = vmatpush.msra.mxu3 %v602_v14  ;;  %v600_v17 = vld [vmem:[#allocation10 + $0x50] sm:$0xff]  ;;  %v599_v19 = vld [vmem:[#allocation10 + $0x48] sm:$0xff] }
 0x1a1   :  { %v427_v23 = vmul.f32 1.0614054, %v410_v22  ;;  %v414_v24 = vsub.f32 1.0, %v413_v21  ;;  %v1331_v3 = vpop.eup %1330  ;;  %v598_v21 = vld [vmem:[#allocation10 + $0x40] sm:$0xff] }
 0x1a2   :  { %614 = vmatpush.msra.mxu3 %v601_v0 }
 0x1a3   :  { %v429_v26 = vadd.f32 -1.4531521, %v427_v23  ;;  %v415_v30 = vmul.f32 %v1327_v18, %v414_v24  ;;  %v597_v24 = vld [vmem:[#allocation10 + $0x38] sm:$0xff] }
 0x1a4   :  { %615 = vmatpush.msra.mxu3 %v600_v17 }
 0x1a5   :  { %v431_v32 = vmul.f32 %v429_v26, %v410_v22  ;;  %v416_v33 = vadd.f32 %v1327_v18, %v415_v30  ;;  %v595_v30 = vld [vmem:[#allocation10 + $0x28] sm:$0xff] }
 0x1a6   :  { %616 = vmatpush.msra.mxu3 %v599_v19 }
 0x1a7   :  { %v433_v34 = vadd.f32 1.4214138, %v431_v32  ;;  %v420_v39 = vsel %vm419_vm0, %v1327_v18, %v416_v33  ;;  %v594_v32 = vld [vmem:[#allocation10 + $0x20] sm:$0xff] }
 0x1a8   :  { %v425_v42 = vsel %vm422_vm1, %v424_v36, %v420_v39  ;;  %617 = vmatpush.msra.mxu3 %v598_v21  ;;  %v593_v36 = vld [vmem:[#allocation10 + $0x18] sm:$0xff] }
 0x1a9   :  { %v435_v41 = vmul.f32 %v433_v34, %v410_v22  ;;  %v428_v43 = vmul.f32 1.0614054, %v425_v42 }
 0x1aa   :  { %618 = vmatpush.msra.mxu3 %v597_v24 }
 0x1ab   :  { %v437_v44 = vadd.f32 -0.28449672, %v435_v41  ;;  %v430_v45 = vadd.f32 -1.4531521, %v428_v43 }
 0x1ac   :  { %619 = vmatpush.msra.mxu3 %v596_v28 }
 0x1ad   :  { %v439_v27 = vmul.f32 %v437_v44, %v410_v22  ;;  %v432_v47 = vmul.f32 %v430_v45, %v425_v42 }
 0x1ae   :  { %620 = vmatpush.msra.mxu3 %v595_v30 }
 0x1af   :  { %v441_v48 = vadd.f32 0.2548296, %v439_v27  ;;  %v434_v49 = vadd.f32 1.4214138, %v432_v47 }
 0x1b0   :  { %621 = vmatpush.msra.mxu3 %v594_v32 }
 0x1b1   :  { %v443_v51 = vmul.f32 %v441_v48, %v410_v22  ;;  %v436_v53 = vmul.f32 %v434_v49, %v425_v42 }
 0x1b2   :  { %622 = vmatpush.msra.mxu3 %v593_v36 }
 0x1b3   :  { %v453_v55 = vmul.f32 %v1329_v52, %v443_v51  ;;  %v438_v56 = vadd.f32 -0.28449672, %v436_v53 }
 0x1b4   :  { %623 = vmatpush.msra.mxu3 %v592_v40 }
 0x1b5   :  { %v455_v57 = vsub.f32 1.0, %v453_v55  ;;  %v440_v58 = vmul.f32 %v438_v56, %v425_v42 }
 0x1b7   :  { %v459_v59 = vsub.f32 0.0, %v455_v57  ;;  %v442_v60 = vadd.f32 0.2548296, %v440_v58 }
 0x1b9   :  { %v461_v61 = vsel %vm457_vm2, %v459_v59, %v455_v57  ;;  %v444_v2 = vmul.f32 %v442_v60, %v425_v42  ;;  %v591_v42 = vld [vmem:[#allocation10 + $0x8] sm:$0xff] }
 0x1ba   :  { %v463_v1 = vadd.f32 1.0, %v461_v61  ;;  %624 = vmatpush.msra.mxu3 %v591_v42 }
 0x1bb   :  { %v454_v5 = vmul.f32 %v1331_v3, %v444_v2 }
 0x1bc   :  { %v465_v4 = vmul.f32 %v463_v1, %v387_v63  ;;  %625 = vmatpush.msra.mxu3 %v590_v46 }
 0x1bd   :  { %v456_v6 = vsub.f32 1.0, %v454_v5 }
 0x1be   :  { %503 = vmatmul.f32.vlgmr.msra.gmra.mxu2 %v465_v4 }
 0x1bf   :  { %v460_v7 = vsub.f32 0.0, %v456_v6 }
 0x1c1   :  { %v462_v8 = vsel %vm458_vm3, %v460_v7, %v456_v6 }
 0x1c2   :  { %v464_v10 = vadd.f32 1.0, %v462_v8 }
 0x1c4   :  { %v466_v11 = vmul.f32 %v464_v10, %v388_v9 }
 0x1c6   :  { %506 = vmatmul.f32.gmra.mxu2 %v466_v11 }
 0x241   :  { %v504_v15 = vpop.f32.mrf.mxu2 }
 0x242   :  { %v1872_v16 = vadd.f32 %v1309_v37, %v504_v15 }
 0x244   :  { %v1875_v62 = vmul.f32 0.70710677, %v1872_v16  ;;  %v510_v28 = vmul.f32 0.5, %v1872_v16  ;;  %v1310_v16 = vld [vmem:[%s2014_s8] ss:$0 sm:$0xff] }
 0x246   :  { %v514_v18 = vand.u32 2147483647, %v1875_v62  ;;  %vm580_vm12 = vcmp.lt.f32.partialorder %v1875_v62, 0.0  ;;  %v730_v62 = vld [vmem:[#allocation11 + $0x78] sm:$0xff] }
 0x247   :  { %735 = vmatpush.msrb.mxu0 %v730_v62 }
 0x248   :  { %v516_v20 = vmul.f32 0.3275911, %v514_v18  ;;  %v568_v50 = vsub.f32 0.0, %v514_v18 }
 0x249   :  { %v507_v23 = vpop.f32.mrf.mxu2 }
 0x24a   :  { %v518_v22 = vadd.f32 1.0, %v516_v20  ;;  %v1878_v26 = vadd.f32 %v1309_v37, %v507_v23  ;;  %v570_v58 = vmul.f32 %v568_v50, %v514_v18  ;;  %v724_v50 = vld [vmem:[#allocation11 + $0x48] sm:$0xff] }
 0x24c   :  { %1332 = vrcp.f32 %v518_v22  ;;  %v1881_v29 = vmul.f32 0.70710677, %v1878_v26  ;;  %v531_v43 = vand.u32 2147483648, %v518_v22  ;;  %v529_v45 = vand.u32 2147483647, %v518_v22 }
 0x24d   :  { %vm525_vm5 = vweird.f32 %v518_v22  ;;  %v572_v3 = vmul.f32 1.442695, %v570_v58  ;;  %v511_v40 = vmul.f32 0.5, %v1878_v26  ;;  %v726_v26 = vld [vmem:[#allocation11 + $0x58] sm:$0xff]  ;;  %v721_v58 = vld [vmem:[#allocation11 + $0x30] sm:$0xff] }
 0x24e   :  { %v515_v31 = vand.u32 2147483647, %v1881_v29  ;;  %v532_v47 = vor.u32 1.1754944e-38, %v531_v43  ;;  %vm530_vm7 = vcmp.eq.f32.partialorder %v529_v45, 8.507059e+37  ;;  %vm581_vm13 = vcmp.lt.f32.partialorder %v1881_v29, 0.0  ;;  %v729_v43 = vld [vmem:[#allocation11 + $0x70] sm:$0xff] }
 0x24f   :  { %736 = vmatpush.msrb.mxu0 %v729_v43 }
 0x250   :  { %v517_v33 = vmul.f32 0.3275911, %v515_v31  ;;  %v569_v5 = vsub.f32 0.0, %v515_v31 }
 0x252   :  { %v1333_v34 = vpop.eup %1332  ;;  %v519_v39 = vadd.f32 1.0, %v517_v33  ;;  %v571_v11 = vmul.f32 %v569_v5, %v515_v31 }
 0x253   :  { %v521_v38 = vmul.f32 %v1333_v34, %v518_v22  ;;  %vm526_vm4 = vweird.f32 %v1333_v34 }
 0x254   :  { %1334 = vrcp.f32 %v519_v39  ;;  %vm527_vm6 = vmor %vm525_vm5, %vm526_vm4  ;;  %v546_v57 = vand.u32 2147483648, %v519_v39  ;;  %v544_v60 = vand.u32 2147483647, %v519_v39  ;;  %vm540_vm9 = vweird.f32 %v519_v39 }
 0x255   :  { %v522_v41 = vsub.f32 1.0, %v521_v38  ;;  %1336 = vpow2.f32 %v572_v3  ;;  %v574_v14 = vmul.f32 1.442695, %v571_v11  ;;  %v718_v3 = vld [vmem:[#allocation11 + $0x18] sm:$0xff]  ;;  %v715_v11 = vld [vmem:[#allocation11] sm:$0xff] }
 0x256   :  { %v547_v2 = vor.u32 1.1754944e-38, %v546_v57  ;;  %vm545_vm11 = vcmp.eq.f32.partialorder %v544_v60, 8.507059e+37  ;;  %v722_v57 = vld [vmem:[#allocation11 + $0x38] sm:$0xff]  ;;  %v720_v60 = vld [vmem:[#allocation11 + $0x28] sm:$0xff] }
 0x257   :  { %v523_v44 = vmul.f32 %v1333_v34, %v522_v41  ;;  %1338 = vpow2.f32 %v574_v14 }
 0x259   :  { %v524_v27 = vadd.f32 %v1333_v34, %v523_v44  ;;  %v728_v44 = vld [vmem:[#allocation11 + $0x68] sm:$0xff] }
 0x25a   :  { %v1335_v48 = vpop.eup %1334  ;;  %737 = vmatpush.msrb.mxu0 %v728_v44 }
 0x25b   :  { %v528_v49 = vsel %vm527_vm6, %v1333_v34, %v524_v27  ;;  %v536_v51 = vmul.f32 %v1335_v48, %v519_v39  ;;  %vm541_vm8 = vweird.f32 %v1335_v48  ;;  %v1337_v0 = vpop.eup %1336  ;;  %v727_v27 = vld [vmem:[#allocation11 + $0x60] sm:$0xff] }
 0x25c   :  { %v533_v52 = vsel %vm530_vm7, %v532_v47, %v528_v49  ;;  %vm542_vm10 = vmor %vm540_vm9, %vm541_vm8  ;;  %738 = vmatpush.msrb.mxu0 %v727_v27 }
 0x25d   :  { %v550_v53 = vmul.f32 1.0614054, %v533_v52  ;;  %v537_v55 = vsub.f32 1.0, %v536_v51  ;;  %v1339_v32 = vpop.eup %1338 }
 0x25e   :  { %739 = vmatpush.msrb.mxu0 %v726_v26 }
 0x25f   :  { %v552_v56 = vadd.f32 -1.4531521, %v550_v53  ;;  %v538_v59 = vmul.f32 %v1335_v48, %v537_v55  ;;  %v723_v53 = vld [vmem:[#allocation11 + $0x40] sm:$0xff] }
 0x261   :  { %v554_v61 = vmul.f32 %v552_v56, %v533_v52  ;;  %v539_v63 = vadd.f32 %v1335_v48, %v538_v59 }
 0x263   :  { %v556_v1 = vadd.f32 1.4214138, %v554_v61  ;;  %v543_v4 = vsel %vm542_vm10, %v1335_v48, %v539_v63  ;;  %v725_v48 = vld [vmem:[#allocation11 + $0x50] sm:$0xff]  ;;  %v719_v63 = vld [vmem:[#allocation11 + $0x20] sm:$0xff] }
 0x264   :  { %v548_v7 = vsel %vm545_vm11, %v547_v2, %v543_v4  ;;  %740 = vmatpush.msrb.mxu0 %v725_v48 }
 0x265   :  { %v558_v6 = vmul.f32 %v556_v1, %v533_v52  ;;  %v551_v8 = vmul.f32 1.0614054, %v548_v7 }
 0x266   :  { %741 = vmatpush.msrb.mxu0 %v724_v50 }
 0x267   :  { %v560_v9 = vadd.f32 -0.28449672, %v558_v6  ;;  %v553_v10 = vadd.f32 -1.4531521, %v551_v8  ;;  %v716_v8 = vld [vmem:[#allocation11 + $0x8] sm:$0xff] }
 0x268   :  { %742 = vmatpush.msrb.mxu0 %v723_v53 }
 0x269   :  { %v562_v54 = vmul.f32 %v560_v9, %v533_v52  ;;  %v555_v37 = vmul.f32 %v553_v10, %v548_v7 }
 0x26a   :  { %743 = vmatpush.msrb.mxu0 %v722_v57 }
 0x26b   :  { %v564_v12 = vadd.f32 0.2548296, %v562_v54  ;;  %v557_v13 = vadd.f32 1.4214138, %v555_v37 }
 0x26c   :  { %744 = vmatpush.msrb.mxu0 %v721_v58 }
 0x26d   :  { %v566_v15 = vmul.f32 %v564_v12, %v533_v52  ;;  %v559_v17 = vmul.f32 %v557_v13, %v548_v7 }
 0x26e   :  { %745 = vmatpush.msrb.mxu0 %v720_v60 }
 0x26f   :  { %v576_v18 = vmul.f32 %v1337_v0, %v566_v15  ;;  %v561_v19 = vadd.f32 -0.28449672, %v559_v17 }
 0x270   :  { %746 = vmatpush.msrb.mxu0 %v719_v63 }
 0x271   :  { %v578_v20 = vsub.f32 1.0, %v576_v18  ;;  %v563_v21 = vmul.f32 %v561_v19, %v548_v7 }
 0x272   :  { %747 = vmatpush.msrb.mxu0 %v718_v3 }
 0x273   :  { %v582_v22 = vsub.f32 0.0, %v578_v20  ;;  %v565_v23 = vadd.f32 0.2548296, %v563_v21 }
 0x275   :  { %v584_v24 = vsel %vm580_vm12, %v582_v22, %v578_v20  ;;  %v567_v31 = vmul.f32 %v565_v23, %v548_v7 }
 0x276   :  { %v586_v30 = vadd.f32 1.0, %v584_v24 }
 0x277   :  { %v577_v34 = vmul.f32 %v1339_v32, %v567_v31 }
 0x278   :  { %v588_v33 = vmul.f32 %v586_v30, %v510_v28 }
 0x279   :  { %v579_v36 = vsub.f32 1.0, %v577_v34 }
 0x27a   :  { %626 = vmatmul.f32.vlgmr.msra.gmra.mxu3 %v588_v33 }
 0x27b   :  { %v583_v38 = vsub.f32 0.0, %v579_v36 }
 0x27d   :  { %v585_v39 = vsel %vm581_vm13, %v583_v38, %v579_v36 }
 0x27e   :  { %v587_v41 = vadd.f32 1.0, %v585_v39 }
 0x280   :  { %v589_v42 = vmul.f32 %v587_v41, %v511_v40 }
 0x282   :  { %629 = vmatmul.f32.gmra.mxu3 %v589_v42 }
 0x2fd   :  { %v627_v45 = vpop.f32.mrf.mxu3 }
 0x2fe   :  { %v628_v46 = vadd.f32 %v1310_v16, %v627_v45 }
 0x300   :  { %v1892_v29 = vadd.f32 %v628_v46, %v1834_v25 }
 0x302   :  { %v1895_v47 = vmul.f32 0.70710677, %v1892_v29 }
 0x304   :  { %v639_v49 = vand.u32 2147483647, %v1895_v47  ;;  %vm705_vm6 = vcmp.lt.f32.partialorder %v1895_v47, 0.0  ;;  %v853_v47 = vld [vmem:[#allocation13 + $0x78] sm:$0xff] }
 0x305   :  { %v630_v52 = vpop.f32.mrf.mxu3  ;;  %858 = vmatpush.msrb.mxu1 %v853_v47 }
 0x306   :  { %v641_v51 = vmul.f32 0.3275911, %v639_v49  ;;  %v631_v55 = vadd.f32 %v1310_v16, %v630_v52  ;;  %v693_v14 = vsub.f32 0.0, %v639_v49 }
 0x308   :  { %v643_v56 = vadd.f32 1.0, %v641_v51  ;;  %v1899_v25 = vadd.f32 %v631_v55, %v1840_v35  ;;  %v717_v35 = vld [vmem:[#allocation11 + $0x10] sm:$0xff]  ;;  %v695_v21 = vmul.f32 %v693_v14, %v639_v49 }
 0x309   :  { %748 = vmatpush.msrb.mxu0 %v717_v35 }
 0x30a   :  { %1340 = vrcp.f32 %v643_v56  ;;  %v1902_v59 = vmul.f32 0.70710677, %v1899_v25  ;;  %v656_v7 = vand.u32 2147483648, %v643_v56  ;;  %v654_v10 = vand.u32 2147483647, %v643_v56 }
 0x30b   :  { %vm650_vm15 = vweird.f32 %v643_v56  ;;  %749 = vmatpush.msrb.mxu0 %v716_v8  ;;  %v697_v32 = vmul.f32 1.442695, %v695_v21  ;;  %v850_v8 = vld [vmem:[#allocation13 + $0x60] sm:$0xff] }
 0x30c   :  { %v640_v61 = vand.u32 2147483647, %v1902_v59  ;;  %v657_v37 = vor.u32 1.1754944e-38, %v656_v7  ;;  %vm655_vm1 = vcmp.eq.f32.partialorder %v654_v10, 8.507059e+37  ;;  %vm706_vm7 = vcmp.lt.f32.partialorder %v1902_v59, 0.0  ;;  %v851_v7 = vld [vmem:[#allocation13 + $0x68] sm:$0xff] }
 0x30d   :  { %750 = vmatpush.msrb.mxu0 %v715_v11  ;;  %v849_v59 = vld [vmem:[#allocation13 + $0x58] sm:$0xff]  ;;  %v848_v11 = vld [vmem:[#allocation13 + $0x50] sm:$0xff] }
 0x30e   :  { %v642_v1 = vmul.f32 0.3275911, %v640_v61  ;;  %v694_v34 = vsub.f32 0.0, %v640_v61 }
 0x310   :  { %v1341_v2 = vpop.eup %1340  ;;  %v644_v5 = vadd.f32 1.0, %v642_v1  ;;  %v696_v42 = vmul.f32 %v694_v34, %v640_v61  ;;  %v839_v34 = vld [vmem:[#allocation13 + $0x8] sm:$0xff] }
 0x311   :  { %v646_v4 = vmul.f32 %v1341_v2, %v643_v56  ;;  %vm651_vm14 = vweird.f32 %v1341_v2  ;;  %v635_v56 = vmul.f32 0.5, %v1892_v29  ;;  %v1311_v29 = vld [vmem:[%s2016_s10] ss:$0 sm:$0xff] }
 0x312   :  { %1342 = vrcp.f32 %v644_v5  ;;  %vm652_vm0 = vmor %vm650_vm15, %vm651_vm14  ;;  %v671_v20 = vand.u32 2147483648, %v644_v5  ;;  %v669_v23 = vand.u32 2147483647, %v644_v5  ;;  %vm665_vm3 = vweird.f32 %v644_v5 }
 0x313   :  { %v647_v6 = vsub.f32 1.0, %v646_v4  ;;  %1344 = vpow2.f32 %v697_v32  ;;  %v699_v45 = vmul.f32 1.442695, %v696_v42  ;;  %v636_v4 = vmul.f32 0.5, %v1899_v25  ;;  %v840_v32 = vld [vmem:[#allocation13 + $0x10] sm:$0xff] }
 0x314   :  { %v672_v31 = vor.u32 1.1754944e-38, %v671_v20  ;;  %vm670_vm5 = vcmp.eq.f32.partialorder %v669_v23, 8.507059e+37  ;;  %v843_v20 = vld [vmem:[#allocation13 + $0x28] sm:$0xff] }
 0x315   :  { %v648_v9 = vmul.f32 %v1341_v2, %v647_v6  ;;  %1346 = vpow2.f32 %v699_v45  ;;  %v852_v6 = vld [vmem:[#allocation13 + $0x70] sm:$0xff] }
 0x316   :  { %859 = vmatpush.msrb.mxu1 %v852_v6 }
 0x317   :  { %v649_v54 = vadd.f32 %v1341_v2, %v648_v9 }
 0x318   :  { %v1343_v12 = vpop.eup %1342  ;;  %860 = vmatpush.msrb.mxu1 %v851_v7 }
 0x319   :  { %v653_v13 = vsel %vm652_vm0, %v1341_v2, %v649_v54  ;;  %v661_v15 = vmul.f32 %v1343_v12, %v644_v5  ;;  %vm666_vm2 = vweird.f32 %v1343_v12  ;;  %v1345_v27 = vpop.eup %1344 }
 0x31a   :  { %v658_v0 = vsel %vm655_vm1, %v657_v37, %v653_v13  ;;  %vm667_vm4 = vmor %vm665_vm3, %vm666_vm2  ;;  %861 = vmatpush.msrb.mxu1 %v850_v8  ;;  %v847_v37 = vld [vmem:[#allocation13 + $0x48] sm:$0xff]  ;;  %v846_v13 = vld [vmem:[#allocation13 + $0x40] sm:$0xff] }
 0x31b   :  { %v675_v17 = vmul.f32 1.0614054, %v658_v0  ;;  %v662_v18 = vsub.f32 1.0, %v661_v15  ;;  %v1347_v60 = vpop.eup %1346 }
 0x31c   :  { %862 = vmatpush.msrb.mxu1 %v849_v59 }
 0x31d   :  { %v677_v19 = vadd.f32 -1.4531521, %v675_v17  ;;  %v663_v22 = vmul.f32 %v1343_v12, %v662_v18  ;;  %v844_v18 = vld [vmem:[#allocation13 + $0x30] sm:$0xff] }
 0x31e   :  { %863 = vmatpush.msrb.mxu1 %v848_v11 }
 0x31f   :  { %v679_v24 = vmul.f32 %v677_v19, %v658_v0  ;;  %v664_v28 = vadd.f32 %v1343_v12, %v663_v22  ;;  %v842_v22 = vld [vmem:[#allocation13 + $0x20] sm:$0xff] }
 0x320   :  { %864 = vmatpush.msrb.mxu1 %v847_v37 }
 0x321   :  { %v681_v30 = vadd.f32 1.4214138, %v679_v24  ;;  %v668_v33 = vsel %vm667_vm4, %v1343_v12, %v664_v28  ;;  %v841_v28 = vld [vmem:[#allocation13 + $0x18] sm:$0xff] }
 0x322   :  { %v673_v38 = vsel %vm670_vm5, %v672_v31, %v668_v33  ;;  %865 = vmatpush.msrb.mxu1 %v846_v13 }
 0x323   :  { %v683_v36 = vmul.f32 %v681_v30, %v658_v0  ;;  %v676_v39 = vmul.f32 1.0614054, %v673_v38 }
 0x325   :  { %v685_v40 = vadd.f32 -0.28449672, %v683_v36  ;;  %v678_v41 = vadd.f32 -1.4531521, %v676_v39 }
 0x327   :  { %v687_v16 = vmul.f32 %v685_v40, %v658_v0  ;;  %v680_v62 = vmul.f32 %v678_v41, %v673_v38  ;;  %v838_v40 = vld [vmem:[#allocation13] sm:$0xff] }
 0x329   :  { %v689_v43 = vadd.f32 0.2548296, %v687_v16  ;;  %v682_v44 = vadd.f32 1.4214138, %v680_v62 }
 0x32b   :  { %v691_v46 = vmul.f32 %v689_v43, %v658_v0  ;;  %v684_v26 = vmul.f32 %v682_v44, %v673_v38  ;;  %v845_v0 = vld [vmem:[#allocation13 + $0x38] sm:$0xff] }
 0x32c   :  { %866 = vmatpush.msrb.mxu1 %v845_v0 }
 0x32d   :  { %v701_v48 = vmul.f32 %v1345_v27, %v691_v46  ;;  %v686_v49 = vadd.f32 -0.28449672, %v684_v26 }
 0x32e   :  { %867 = vmatpush.msrb.mxu1 %v844_v18 }
 0x32f   :  { %v703_v50 = vsub.f32 1.0, %v701_v48  ;;  %v688_v51 = vmul.f32 %v686_v49, %v673_v38 }
 0x330   :  { %868 = vmatpush.msrb.mxu1 %v843_v20 }
 0x331   :  { %v707_v52 = vsub.f32 0.0, %v703_v50  ;;  %v690_v53 = vadd.f32 0.2548296, %v688_v51 }
 0x332   :  { %869 = vmatpush.msrb.mxu1 %v842_v22 }
 0x333   :  { %v709_v55 = vsel %vm705_vm6, %v707_v52, %v703_v50  ;;  %v692_v58 = vmul.f32 %v690_v53, %v673_v38 }
 0x334   :  { %v711_v57 = vadd.f32 1.0, %v709_v55  ;;  %870 = vmatpush.msrb.mxu1 %v841_v28 }
 0x335   :  { %v702_v63 = vmul.f32 %v1347_v60, %v692_v58 }
 0x336   :  { %v713_v61 = vmul.f32 %v711_v57, %v635_v56  ;;  %871 = vmatpush.msrb.mxu1 %v840_v32 }
 0x337   :  { %v704_v1 = vsub.f32 1.0, %v702_v63 }
 0x338   :  { %751 = vmatmul.f32.vlgmr.msrb.gmra.mxu0 %v713_v61  ;;  %872 = vmatpush.msrb.mxu1 %v839_v34  ;;  %v975_v34 = vld [vmem:[#allocation14 + $0x70] sm:$0xff] }
 0x339   :  { %v708_v2 = vsub.f32 0.0, %v704_v1 }
 0x33a   :  { %873 = vmatpush.msrb.mxu1 %v838_v40 }
 0x33b   :  { %v710_v3 = vsel %vm706_vm7, %v708_v2, %v704_v1 }
 0x33c   :  { %v712_v5 = vadd.f32 1.0, %v710_v3 }
 0x33e   :  { %v714_v35 = vmul.f32 %v712_v5, %v636_v4 }
 0x340   :  { %754 = vmatmul.f32.gmra.mxu0 %v714_v35 }
 0x3b5   :  { %v752_v9 = vpop.f32.mrf.mxu0 }
 0x3b6   :  { %v1912_v10 = vadd.f32 %v1311_v29, %v752_v9 }
 0x3b8   :  { %v1915_v25 = vmul.f32 0.70710677, %v1912_v10 }
 0x3ba   :  { %v762_v54 = vand.u32 2147483647, %v1915_v25  ;;  %vm828_vm0 = vcmp.lt.f32.partialorder %v1915_v25, 0.0  ;;  %v976_v25 = vld [vmem:[#allocation14 + $0x78] sm:$0xff] }
 0x3bb   :  { %981 = vmatpush.msrb.mxu2 %v976_v25 }
 0x3bc   :  { %v764_v12 = vmul.f32 0.3275911, %v762_v54  ;;  %v816_v43 = vsub.f32 0.0, %v762_v54 }
 0x3bd   :  { %v755_v15 = vpop.f32.mrf.mxu0  ;;  %982 = vmatpush.msrb.mxu2 %v975_v34 }
 0x3be   :  { %v766_v14 = vadd.f32 1.0, %v764_v12  ;;  %v1918_v17 = vadd.f32 %v1311_v29, %v755_v15  ;;  %v818_v49 = vmul.f32 %v816_v43, %v762_v54  ;;  %v758_v15 = vmul.f32 0.5, %v1912_v10 }
 0x3c0   :  { %1348 = vrcp.f32 %v766_v14  ;;  %v1921_v19 = vmul.f32 0.70710677, %v1918_v17  ;;  %v779_v36 = vand.u32 2147483648, %v766_v14  ;;  %v777_v39 = vand.u32 2147483647, %v766_v14 }
 0x3c1   :  { %vm773_vm9 = vweird.f32 %v766_v14  ;;  %v820_v57 = vmul.f32 1.442695, %v818_v49 }
 0x3c2   :  { %v763_v21 = vand.u32 2147483647, %v1921_v19  ;;  %v780_v42 = vor.u32 1.1754944e-38, %v779_v36  ;;  %vm778_vm11 = vcmp.eq.f32.partialorder %v777_v39, 8.507059e+37  ;;  %vm829_vm1 = vcmp.lt.f32.partialorder %v1921_v19, 0.0  ;;  %v974_v36 = vld [vmem:[#allocation14 + $0x68] sm:$0xff] }
 0x3c3   :  { %983 = vmatpush.msrb.mxu2 %v974_v36  ;;  %v972_v19 = vld [vmem:[#allocation14 + $0x58] sm:$0xff] }
 0x3c4   :  { %v765_v23 = vmul.f32 0.3275911, %v763_v21  ;;  %v817_v60 = vsub.f32 0.0, %v763_v21 }
 0x3c6   :  { %v1349_v24 = vpop.eup %1348  ;;  %v767_v31 = vadd.f32 1.0, %v765_v23  ;;  %v819_v4 = vmul.f32 %v817_v60, %v763_v21  ;;  %v963_v60 = vld [vmem:[#allocation14 + $0x10] sm:$0xff] }
 0x3c7   :  { %v769_v30 = vmul.f32 %v1349_v24, %v766_v14  ;;  %vm774_vm8 = vweird.f32 %v1349_v24 }
 0x3c8   :  { %1350 = vrcp.f32 %v767_v31  ;;  %vm775_vm10 = vmor %vm773_vm9, %vm774_vm8  ;;  %v794_v48 = vand.u32 2147483648, %v767_v31  ;;  %v792_v51 = vand.u32 2147483647, %v767_v31  ;;  %vm788_vm13 = vweird.f32 %v767_v31 }
 0x3c9   :  { %v770_v33 = vsub.f32 1.0, %v769_v30  ;;  %1352 = vpow2.f32 %v820_v57  ;;  %v822_v6 = vmul.f32 1.442695, %v819_v4  ;;  %v759_v30 = vmul.f32 0.5, %v1918_v17  ;;  %v961_v4 = vld [vmem:[#allocation14] sm:$0xff] }
 0x3ca   :  { %v795_v56 = vor.u32 1.1754944e-38, %v794_v48  ;;  %vm793_vm15 = vcmp.eq.f32.partialorder %v792_v51, 8.507059e+37  ;;  %v967_v48 = vld [vmem:[#allocation14 + $0x30] sm:$0xff] }
 0x3cb   :  { %v771_v38 = vmul.f32 %v1349_v24, %v770_v33  ;;  %1354 = vpow2.f32 %v822_v6  ;;  %v1312_v33 = vld [vmem:[%s2018_s12] ss:$0 sm:$0xff] }
 0x3cd   :  { %v772_v41 = vadd.f32 %v1349_v24, %v771_v38  ;;  %v973_v38 = vld [vmem:[#allocation14 + $0x60] sm:$0xff] }
 0x3ce   :  { %v1351_v16 = vpop.eup %1350  ;;  %984 = vmatpush.msrb.mxu2 %v973_v38 }
 0x3cf   :  { %v776_v62 = vsel %vm775_vm10, %v1349_v24, %v772_v41  ;;  %v784_v44 = vmul.f32 %v1351_v16, %v767_v31  ;;  %vm789_vm12 = vweird.f32 %v1351_v16  ;;  %v1353_v8 = vpop.eup %1352 }
 0x3d0   :  { %v781_v45 = vsel %vm778_vm11, %v780_v42, %v776_v62  ;;  %vm790_vm14 = vmor %vm788_vm13, %vm789_vm12  ;;  %v971_v42 = vld [vmem:[#allocation14 + $0x50] sm:$0xff]  ;;  %985 = vmatpush.msrb.mxu2 %v972_v19  ;;  %v970_v62 = vld [vmem:[#allocation14 + $0x48] sm:$0xff] }
 0x3d1   :  { %v798_v46 = vmul.f32 1.0614054, %v781_v45  ;;  %v785_v27 = vsub.f32 1.0, %v784_v44  ;;  %v1355_v20 = vpop.eup %1354  ;;  %v969_v44 = vld [vmem:[#allocation14 + $0x40] sm:$0xff] }
 0x3d2   :  { %986 = vmatpush.msrb.mxu2 %v971_v42 }
 0x3d3   :  { %v800_v26 = vadd.f32 -1.4531521, %v798_v46  ;;  %v786_v50 = vmul.f32 %v1351_v16, %v785_v27  ;;  %v968_v27 = vld [vmem:[#allocation14 + $0x38] sm:$0xff] }
 0x3d4   :  { %987 = vmatpush.msrb.mxu2 %v970_v62 }
 0x3d5   :  { %v802_v52 = vmul.f32 %v800_v26, %v781_v45  ;;  %v787_v53 = vadd.f32 %v1351_v16, %v786_v50  ;;  %v966_v50 = vld [vmem:[#allocation14 + $0x28] sm:$0xff] }
 0x3d6   :  { %988 = vmatpush.msrb.mxu2 %v969_v44 }
 0x3d7   :  { %v804_v55 = vadd.f32 1.4214138, %v802_v52  ;;  %v791_v58 = vsel %vm790_vm14, %v1351_v16, %v787_v53  ;;  %v965_v52 = vld [vmem:[#allocation14 + $0x20] sm:$0xff] }
 0x3d8   :  { %v796_v63 = vsel %vm793_vm15, %v795_v56, %v791_v58  ;;  %989 = vmatpush.msrb.mxu2 %v968_v27  ;;  %v964_v56 = vld [vmem:[#allocation14 + $0x18] sm:$0xff] }
 0x3d9   :  { %v806_v61 = vmul.f32 %v804_v55, %v781_v45  ;;  %v799_v1 = vmul.f32 1.0614054, %v796_v63 }
 0x3da   :  { %990 = vmatpush.msrb.mxu2 %v967_v48 }
 0x3db   :  { %v808_v2 = vadd.f32 -0.28449672, %v806_v61  ;;  %v801_v3 = vadd.f32 -1.4531521, %v799_v1  ;;  %v962_v1 = vld [vmem:[#allocation14 + $0x8] sm:$0xff] }
 0x3dc   :  { %991 = vmatpush.msrb.mxu2 %v966_v50 }
 0x3dd   :  { %v810_v5 = vmul.f32 %v808_v2, %v781_v45  ;;  %v803_v35 = vmul.f32 %v801_v3, %v796_v63 }
 0x3de   :  { %992 = vmatpush.msrb.mxu2 %v965_v52 }
 0x3df   :  { %v812_v47 = vadd.f32 0.2548296, %v810_v5  ;;  %v805_v29 = vadd.f32 1.4214138, %v803_v35 }
 0x3e0   :  { %993 = vmatpush.msrb.mxu2 %v964_v56 }
 0x3e1   :  { %v814_v7 = vmul.f32 %v812_v47, %v781_v45  ;;  %v807_v9 = vmul.f32 %v805_v29, %v796_v63 }
 0x3e2   :  { %994 = vmatpush.msrb.mxu2 %v963_v60 }
 0x3e3   :  { %v824_v59 = vmul.f32 %v1353_v8, %v814_v7  ;;  %v809_v11 = vadd.f32 -0.28449672, %v807_v9 }
 0x3e4   :  { %995 = vmatpush.msrb.mxu2 %v962_v1  ;;  %v1098_v1 = vld [vmem:[#allocation16 + $0x70] sm:$0xff] }
 0x3e5   :  { %v826_v54 = vsub.f32 1.0, %v824_v59  ;;  %v811_v37 = vmul.f32 %v809_v11, %v796_v63 }
 0x3e6   :  { %996 = vmatpush.msrb.mxu2 %v961_v4 }
 0x3e7   :  { %v830_v12 = vsub.f32 0.0, %v826_v54  ;;  %v813_v13 = vadd.f32 0.2548296, %v811_v37 }
 0x3e9   :  { %v832_v14 = vsel %vm828_vm0, %v830_v12, %v826_v54  ;;  %v815_v18 = vmul.f32 %v813_v13, %v796_v63 }
 0x3ea   :  { %v834_v0 = vadd.f32 1.0, %v832_v14 }
 0x3eb   :  { %v825_v22 = vmul.f32 %v1355_v20, %v815_v18 }
 0x3ec   :  { %v836_v21 = vmul.f32 %v834_v0, %v758_v15 }
 0x3ed   :  { %v827_v23 = vsub.f32 1.0, %v825_v22 }
 0x3ee   :  { %874 = vmatmul.f32.vlgmr.msrb.gmra.mxu1 %v836_v21 }
 0x3ef   :  { %v831_v24 = vsub.f32 0.0, %v827_v23 }
 0x3f1   :  { %v833_v28 = vsel %vm829_vm1, %v831_v24, %v827_v23 }
 0x3f2   :  { %v835_v31 = vadd.f32 1.0, %v833_v28 }
 0x3f4   :  { %v837_v32 = vmul.f32 %v835_v31, %v759_v30 }
 0x3f6   :  { %877 = vmatmul.f32.gmra.mxu1 %v837_v32 }
 0x46b   :  { %v875_v39 = vpop.f32.mrf.mxu1 }
 0x46c   :  { %v1931_v40 = vadd.f32 %v1312_v33, %v875_v39 }
 0x46e   :  { %v1934_v41 = vmul.f32 0.70710677, %v1931_v40  ;;  %v881_v48 = vmul.f32 0.5, %v1931_v40  ;;  %v1313_v40 = vld [vmem:[%s2020_s14] ss:$0 sm:$0xff] }
 0x470   :  { %v885_v16 = vand.u32 2147483647, %v1934_v41  ;;  %vm951_vm10 = vcmp.lt.f32.partialorder %v1934_v41, 0.0  ;;  %v1099_v41 = vld [vmem:[#allocation16 + $0x78] sm:$0xff] }
 0x471   :  { %1104 = vmatpush.msrb.mxu3 %v1099_v41 }
 0x472   :  { %v887_v43 = vmul.f32 0.3275911, %v885_v16  ;;  %v939_v6 = vsub.f32 0.0, %v885_v16 }
 0x473   :  { %v878_v46 = vpop.f32.mrf.mxu1  ;;  %1105 = vmatpush.msrb.mxu3 %v1098_v1 }
 0x474   :  { %v889_v45 = vadd.f32 1.0, %v887_v43  ;;  %v1937_v26 = vadd.f32 %v1312_v33, %v878_v46  ;;  %v941_v37 = vmul.f32 %v939_v6, %v885_v16 }
 0x476   :  { %1356 = vrcp.f32 %v889_v45  ;;  %v1940_v49 = vmul.f32 0.70710677, %v1937_v26  ;;  %v902_v63 = vand.u32 2147483648, %v889_v45  ;;  %v900_v3 = vand.u32 2147483647, %v889_v45 }
 0x477   :  { %vm896_vm3 = vweird.f32 %v889_v45  ;;  %v943_v20 = vmul.f32 1.442695, %v941_v37  ;;  %v882_v60 = vmul.f32 0.5, %v1937_v26 }
 0x478   :  { %v886_v51 = vand.u32 2147483647, %v1940_v49  ;;  %v903_v35 = vor.u32 1.1754944e-38, %v902_v63  ;;  %vm901_vm5 = vcmp.eq.f32.partialorder %v900_v3, 8.507059e+37  ;;  %vm952_vm11 = vcmp.lt.f32.partialorder %v1940_v49, 0.0  ;;  %v1096_v3 = vld [vmem:[#allocation16 + $0x60] sm:$0xff] }
 0x479   :  { %v1095_v49 = vld [vmem:[#allocation16 + $0x58] sm:$0xff] }
 0x47a   :  { %v888_v53 = vmul.f32 0.3275911, %v886_v51  ;;  %v940_v22 = vsub.f32 0.0, %v886_v51 }
 0x47c   :  { %v1357_v55 = vpop.eup %1356  ;;  %v890_v58 = vadd.f32 1.0, %v888_v53  ;;  %v942_v32 = vmul.f32 %v940_v22, %v886_v51  ;;  %v1086_v22 = vld [vmem:[#allocation16 + $0x10] sm:$0xff] }
 0x47d   :  { %v892_v57 = vmul.f32 %v1357_v55, %v889_v45  ;;  %vm897_vm2 = vweird.f32 %v1357_v55 }
 0x47e   :  { %1358 = vrcp.f32 %v890_v58  ;;  %vm898_vm4 = vmor %vm896_vm3, %vm897_vm2  ;;  %v917_v54 = vand.u32 2147483648, %v890_v58  ;;  %v915_v13 = vand.u32 2147483647, %v890_v58  ;;  %vm911_vm7 = vweird.f32 %v890_v58 }
 0x47f   :  { %v893_v61 = vsub.f32 1.0, %v892_v57  ;;  %1360 = vpow2.f32 %v943_v20  ;;  %v945_v38 = vmul.f32 1.442695, %v942_v32  ;;  %v1084_v32 = vld [vmem:[#allocation16] sm:$0xff] }
 0x480   :  { %v918_v18 = vor.u32 1.1754944e-38, %v917_v54  ;;  %vm916_vm9 = vcmp.eq.f32.partialorder %v915_v13, 8.507059e+37  ;;  %v1090_v54 = vld [vmem:[#allocation16 + $0x30] sm:$0xff] }
 0x481   :  { %v894_v2 = vmul.f32 %v1357_v55, %v893_v61  ;;  %1362 = vpow2.f32 %v945_v38 }
 0x483   :  { %v895_v5 = vadd.f32 %v1357_v55, %v894_v2  ;;  %v1097_v2 = vld [vmem:[#allocation16 + $0x68] sm:$0xff] }
 0x484   :  { %v1359_v47 = vpop.eup %1358  ;;  %1106 = vmatpush.msrb.mxu3 %v1097_v2 }
 0x485   :  { %v899_v29 = vsel %vm898_vm4, %v1357_v55, %v895_v5  ;;  %v907_v7 = vmul.f32 %v1359_v47, %v890_v58  ;;  %vm912_vm6 = vweird.f32 %v1359_v47  ;;  %v1361_v19 = vpop.eup %1360 }
 0x486   :  { %v904_v8 = vsel %vm901_vm5, %v903_v35, %v899_v29  ;;  %vm913_vm8 = vmor %vm911_vm7, %vm912_vm6  ;;  %1107 = vmatpush.msrb.mxu3 %v1096_v3  ;;  %v1094_v35 = vld [vmem:[#allocation16 + $0x50] sm:$0xff]  ;;  %v1093_v29 = vld [vmem:[#allocation16 + $0x48] sm:$0xff] }
 0x487   :  { %v921_v9 = vmul.f32 1.0614054, %v904_v8  ;;  %v908_v59 = vsub.f32 1.0, %v907_v7  ;;  %v1363_v52 = vpop.eup %1362  ;;  %v1092_v7 = vld [vmem:[#allocation16 + $0x40] sm:$0xff] }
 0x488   :  { %1108 = vmatpush.msrb.mxu3 %v1095_v49 }
 0x489   :  { %v923_v11 = vadd.f32 -1.4531521, %v921_v9  ;;  %v909_v12 = vmul.f32 %v1359_v47, %v908_v59  ;;  %v1091_v59 = vld [vmem:[#allocation16 + $0x38] sm:$0xff] }
 0x48a   :  { %1109 = vmatpush.msrb.mxu3 %v1094_v35 }
 0x48b   :  { %v925_v14 = vmul.f32 %v923_v11, %v904_v8  ;;  %v910_v15 = vadd.f32 %v1359_v47, %v909_v12  ;;  %v1089_v12 = vld [vmem:[#allocation16 + $0x28] sm:$0xff] }
 0x48c   :  { %1110 = vmatpush.msrb.mxu3 %v1093_v29 }
 0x48d   :  { %v927_v0 = vadd.f32 1.4214138, %v925_v14  ;;  %v914_v21 = vsel %vm913_vm8, %v1359_v47, %v910_v15  ;;  %v1088_v14 = vld [vmem:[#allocation16 + $0x20] sm:$0xff] }
 0x48e   :  { %v919_v24 = vsel %vm916_vm9, %v918_v18, %v914_v21  ;;  %1111 = vmatpush.msrb.mxu3 %v1092_v7  ;;  %v1087_v18 = vld [vmem:[#allocation16 + $0x18] sm:$0xff] }
 0x48f   :  { %v929_v23 = vmul.f32 %v927_v0, %v904_v8  ;;  %v922_v28 = vmul.f32 1.0614054, %v919_v24 }
 0x490   :  { %1112 = vmatpush.msrb.mxu3 %v1091_v59 }
 0x491   :  { %v931_v30 = vadd.f32 -0.28449672, %v929_v23  ;;  %v924_v31 = vadd.f32 -1.4531521, %v922_v28  ;;  %v1085_v28 = vld [vmem:[#allocation16 + $0x8] sm:$0xff] }
 0x492   :  { %1113 = vmatpush.msrb.mxu3 %v1090_v54 }
 0x493   :  { %v933_v25 = vmul.f32 %v931_v30, %v904_v8  ;;  %v926_v33 = vmul.f32 %v924_v31, %v919_v24 }
 0x494   :  { %1114 = vmatpush.msrb.mxu3 %v1089_v12 }
 0x495   :  { %v935_v34 = vadd.f32 0.2548296, %v933_v25  ;;  %v928_v36 = vadd.f32 1.4214138, %v926_v33 }
 0x496   :  { %1115 = vmatpush.msrb.mxu3 %v1088_v14 }
 0x497   :  { %v937_v39 = vmul.f32 %v935_v34, %v904_v8  ;;  %v930_v42 = vmul.f32 %v928_v36, %v919_v24 }
 0x498   :  { %1116 = vmatpush.msrb.mxu3 %v1087_v18 }
 0x499   :  { %v947_v16 = vmul.f32 %v1361_v19, %v937_v39  ;;  %v932_v62 = vadd.f32 -0.28449672, %v930_v42 }
 0x49a   :  { %1117 = vmatpush.msrb.mxu3 %v1086_v22 }
 0x49b   :  { %v949_v43 = vsub.f32 1.0, %v947_v16  ;;  %v934_v44 = vmul.f32 %v932_v62, %v919_v24 }
 0x49c   :  { %1118 = vmatpush.msrb.mxu3 %v1085_v28  ;;  %v1223_v28 = vld [vmem:[#allocation17 + $0x70] sm:$0xff] }
 0x49d   :  { %v953_v45 = vsub.f32 0.0, %v949_v43  ;;  %v936_v46 = vadd.f32 0.2548296, %v934_v44 }
 0x49e   :  { %1119 = vmatpush.msrb.mxu3 %v1084_v32  ;;  %v1222_v32 = vld [vmem:[#allocation17 + $0x68] sm:$0xff] }
 0x49f   :  { %v955_v27 = vsel %vm951_vm10, %v953_v45, %v949_v43  ;;  %v938_v51 = vmul.f32 %v936_v46, %v919_v24 }
 0x4a0   :  { %v957_v50 = vadd.f32 1.0, %v955_v27 }
 0x4a1   :  { %v948_v55 = vmul.f32 %v1363_v52, %v938_v51 }
 0x4a2   :  { %v959_v53 = vmul.f32 %v957_v50, %v881_v48 }
 0x4a3   :  { %v950_v56 = vsub.f32 1.0, %v948_v55 }
 0x4a4   :  { %997 = vmatmul.f32.vlgmr.msrb.gmra.mxu2 %v959_v53 }
 0x4a5   :  { %v954_v57 = vsub.f32 0.0, %v950_v56 }
 0x4a7   :  { %v956_v58 = vsel %vm952_vm11, %v954_v57, %v950_v56 }
 0x4a8   :  { %v958_v61 = vadd.f32 1.0, %v956_v58 }
 0x4aa   :  { %v960_v63 = vmul.f32 %v958_v61, %v882_v60 }
 0x4ac   :  { %1000 = vmatmul.f32.gmra.mxu2 %v960_v63 }
 0x527   :  { %v998_v4 = vpop.f32.mrf.mxu2 }
 0x528   :  { %v1950_v5 = vadd.f32 %v1313_v40, %v998_v4 }
 0x52a   :  { %v1953_v26 = vmul.f32 0.70710677, %v1950_v5  ;;  %v1004_v54 = vmul.f32 0.5, %v1950_v5  ;;  %v1314_v5 = vld [vmem:[%s2022_s16] ss:$0 sm:$0xff] }
 0x52c   :  { %v1008_v47 = vand.u32 2147483647, %v1953_v26  ;;  %vm1074_vm4 = vcmp.lt.f32.partialorder %v1953_v26, 0.0  ;;  %v1224_v26 = vld [vmem:[#allocation17 + $0x78] sm:$0xff] }
 0x52d   :  { %1229 = vmatpush.msra.mxu0 %v1224_v26  ;;  %1278 = vmatpush.msra.mxu1 %v1224_v26 }
 0x52e   :  { %v1010_v6 = vmul.f32 0.3275911, %v1008_v47  ;;  %v1062_v38 = vsub.f32 0.0, %v1008_v47 }
 0x52f   :  { %v1001_v9 = vpop.f32.mrf.mxu2  ;;  %1230 = vmatpush.msra.mxu0 %v1223_v28  ;;  %1279 = vmatpush.msra.mxu1 %v1223_v28 }
 0x530   :  { %v1012_v8 = vadd.f32 1.0, %v1010_v6  ;;  %v1956_v11 = vadd.f32 %v1313_v40, %v1001_v9  ;;  %v1064_v44 = vmul.f32 %v1062_v38, %v1008_v47 }
 0x531   :  { %1231 = vmatpush.msra.mxu0 %v1222_v32  ;;  %1280 = vmatpush.msra.mxu1 %v1222_v32 }
 0x532   :  { %1364 = vrcp.f32 %v1012_v8  ;;  %v1959_v37 = vmul.f32 0.70710677, %v1956_v11  ;;  %v1025_v24 = vand.u32 2147483648, %v1012_v8  ;;  %v1023_v31 = vand.u32 2147483647, %v1012_v8 }
 0x533   :  { %vm1019_vm13 = vweird.f32 %v1012_v8  ;;  %v1066_v52 = vmul.f32 1.442695, %v1064_v44  ;;  %v1005_v22 = vmul.f32 0.5, %v1956_v11 }
 0x534   :  { %v1009_v13 = vand.u32 2147483647, %v1959_v37  ;;  %v1026_v33 = vor.u32 1.1754944e-38, %v1025_v24  ;;  %vm1024_vm15 = vcmp.eq.f32.partialorder %v1023_v31, 8.507059e+37  ;;  %vm1075_vm5 = vcmp.lt.f32.partialorder %v1959_v37, 0.0  ;;  %v1221_v37 = vld [vmem:[#allocation17 + $0x60] sm:$0xff] }
 0x535   :  { %1232 = vmatpush.msra.mxu0 %v1221_v37  ;;  %1281 = vmatpush.msra.mxu1 %v1221_v37 }
 0x536   :  { %v1011_v15 = vmul.f32 0.3275911, %v1009_v13  ;;  %v1063_v55 = vsub.f32 0.0, %v1009_v13 }
 0x538   :  { %v1365_v0 = vpop.eup %1364  ;;  %v1013_v21 = vadd.f32 1.0, %v1011_v15  ;;  %v1065_v63 = vmul.f32 %v1063_v55, %v1009_v13 }
 0x539   :  { %v1015_v20 = vmul.f32 %v1365_v0, %v1012_v8  ;;  %vm1020_vm12 = vweird.f32 %v1365_v0 }
 0x53a   :  { %1366 = vrcp.f32 %v1013_v21  ;;  %vm1021_vm14 = vmor %vm1019_vm13, %vm1020_vm12  ;;  %v1040_v43 = vand.u32 2147483648, %v1013_v21  ;;  %v1038_v46 = vand.u32 2147483647, %v1013_v21  ;;  %vm1034_vm1 = vweird.f32 %v1013_v21 }
 0x53b   :  { %v1016_v23 = vsub.f32 1.0, %v1015_v20  ;;  %1368 = vpow2.f32 %v1066_v52  ;;  %v1068_v3 = vmul.f32 1.442695, %v1065_v63 }
 0x53c   :  { %v1041_v51 = vor.u32 1.1754944e-38, %v1040_v43  ;;  %vm1039_vm3 = vcmp.eq.f32.partialorder %v1038_v46, 8.507059e+37  ;;  %v1216_v43 = vld [vmem:[#allocation17 + $0x38] sm:$0xff] }
 0x53d   :  { %v1017_v30 = vmul.f32 %v1365_v0, %v1016_v23  ;;  %1370 = vpow2.f32 %v1068_v3 }
 0x53f   :  { %v1018_v25 = vadd.f32 %v1365_v0, %v1017_v30 }
 0x540   :  { %v1367_v34 = vpop.eup %1366 }
 0x541   :  { %v1022_v36 = vsel %vm1021_vm14, %v1365_v0, %v1018_v25  ;;  %v1030_v39 = vmul.f32 %v1367_v34, %v1013_v21  ;;  %vm1035_vm0 = vweird.f32 %v1367_v34  ;;  %v1369_v49 = vpop.eup %1368 }
 0x542   :  { %v1027_v19 = vsel %vm1024_vm15, %v1026_v33, %v1022_v36  ;;  %vm1036_vm2 = vmor %vm1034_vm1, %vm1035_vm0  ;;  %v1220_v33 = vld [vmem:[#allocation17 + $0x58] sm:$0xff]  ;;  %v1219_v36 = vld [vmem:[#allocation17 + $0x50] sm:$0xff] }
 0x543   :  { %v1044_v42 = vmul.f32 1.0614054, %v1027_v19  ;;  %v1031_v16 = vsub.f32 1.0, %v1030_v39  ;;  %v1371_v14 = vpop.eup %1370  ;;  %1233 = vmatpush.msra.mxu0 %v1220_v33  ;;  %1282 = vmatpush.msra.mxu1 %v1220_v33 }
 0x545   :  { %v1046_v62 = vadd.f32 -1.4531521, %v1044_v42  ;;  %v1032_v45 = vmul.f32 %v1367_v34, %v1031_v16  ;;  %1234 = vmatpush.msra.mxu0 %v1219_v36  ;;  %1283 = vmatpush.msra.mxu1 %v1219_v36  ;;  %v1217_v16 = vld [vmem:[#allocation17 + $0x40] sm:$0xff] }
 0x547   :  { %v1048_v27 = vmul.f32 %v1046_v62, %v1027_v19  ;;  %v1033_v48 = vadd.f32 %v1367_v34, %v1032_v45  ;;  %v1215_v45 = vld [vmem:[#allocation17 + $0x30] sm:$0xff] }
 0x549   :  { %v1050_v50 = vadd.f32 1.4214138, %v1048_v27  ;;  %v1037_v53 = vsel %vm1036_vm2, %v1367_v34, %v1033_v48  ;;  %v1214_v27 = vld [vmem:[#allocation17 + $0x28] sm:$0xff] }
 0x54a   :  { %v1042_v57 = vsel %vm1039_vm3, %v1041_v51, %v1037_v53  ;;  %v1212_v53 = vld [vmem:[#allocation17 + $0x18] sm:$0xff] }
 0x54b   :  { %v1052_v56 = vmul.f32 %v1050_v50, %v1027_v19  ;;  %v1045_v58 = vmul.f32 1.0614054, %v1042_v57  ;;  %v1213_v50 = vld [vmem:[#allocation17 + $0x20] sm:$0xff] }
 0x54d   :  { %v1054_v60 = vadd.f32 -0.28449672, %v1052_v56  ;;  %v1047_v61 = vadd.f32 -1.4531521, %v1045_v58 }
 0x54f   :  { %v1056_v41 = vmul.f32 %v1054_v60, %v1027_v19  ;;  %v1049_v40 = vmul.f32 %v1047_v61, %v1042_v57  ;;  %v1210_v61 = vld [vmem:[#allocation17 + $0x8] sm:$0xff] }
 0x551   :  { %v1058_v1 = vadd.f32 0.2548296, %v1056_v41  ;;  %v1051_v2 = vadd.f32 1.4214138, %v1049_v40  ;;  %v1209_v40 = vld [vmem:[#allocation17] sm:$0xff] }
 0x553   :  { %v1060_v4 = vmul.f32 %v1058_v1, %v1027_v19  ;;  %v1053_v35 = vmul.f32 %v1051_v2, %v1042_v57 }
 0x555   :  { %v1070_v47 = vmul.f32 %v1369_v49, %v1060_v4  ;;  %v1055_v29 = vadd.f32 -0.28449672, %v1053_v35 }
 0x557   :  { %v1072_v6 = vsub.f32 1.0, %v1070_v47  ;;  %v1057_v7 = vmul.f32 %v1055_v29, %v1042_v57 }
 0x559   :  { %v1076_v8 = vsub.f32 0.0, %v1072_v6  ;;  %v1059_v9 = vadd.f32 0.2548296, %v1057_v7 }
 0x55b   :  { %v1078_v59 = vsel %vm1074_vm4, %v1076_v8, %v1072_v6  ;;  %v1061_v13 = vmul.f32 %v1059_v9, %v1042_v57  ;;  %v1211_v57 = vld [vmem:[#allocation17 + $0x10] sm:$0xff] }
 0x55c   :  { %v1080_v12 = vadd.f32 1.0, %v1078_v59 }
 0x55d   :  { %v1071_v0 = vmul.f32 %v1371_v14, %v1061_v13 }
 0x55e   :  { %v1082_v15 = vmul.f32 %v1080_v12, %v1004_v54 }
 0x55f   :  { %v1073_v18 = vsub.f32 1.0, %v1071_v0 }
 0x560   :  { %1120 = vmatmul.f32.vlgmr.msrb.gmra.mxu3 %v1082_v15 }
 0x561   :  { %v1077_v20 = vsub.f32 0.0, %v1073_v18 }
 0x563   :  { %v1079_v21 = vsel %vm1075_vm5, %v1077_v20, %v1073_v18 }
 0x564   :  { %v1081_v23 = vadd.f32 1.0, %v1079_v21 }
 0x566   :  { %v1083_v24 = vmul.f32 %v1081_v23, %v1005_v22 }
 0x568   :  { %1123 = vmatmul.f32.gmra.mxu3 %v1083_v24 }
 0x5e3   :  { %v1121_v30 = vpop.f32.mrf.mxu3 }
 0x5e4   :  { %v1122_v31 = vadd.f32 %v1314_v5, %v1121_v30 }
 0x5e6   :  { %v1970_v11 = vadd.f32 %v1122_v31, %v1912_v10  ;;  %v1218_v10 = vld [vmem:[#allocation17 + $0x48] sm:$0xff] }
 0x5e7   :  { %1235 = vmatpush.msra.mxu0 %v1218_v10  ;;  %1284 = vmatpush.msra.mxu1 %v1218_v10 }
 0x5e8   :  { %v1973_v25 = vmul.f32 0.70710677, %v1970_v11 }
 0x5e9   :  { %1236 = vmatpush.msra.mxu0 %v1217_v16  ;;  %1285 = vmatpush.msra.mxu1 %v1217_v16  ;;  %v1129_v16 = vmul.f32 0.5, %v1970_v11  ;;  %v1315_v11 = vld [vmem:[%s2024_s18] ss:$0 sm:$0xff] }
 0x5ea   :  { %v1976_v34 = vand.u32 2147483647, %v1973_v25  ;;  %vm1199_vm14 = vcmp.lt.f32.partialorder %v1973_v25, 0.0 }
 0x5eb   :  { %v1124_v39 = vpop.f32.mrf.mxu3  ;;  %1237 = vmatpush.msra.mxu0 %v1216_v43  ;;  %1286 = vmatpush.msra.mxu1 %v1216_v43 }
 0x5ec   :  { %v1135_v38 = vmul.f32 0.3275911, %v1976_v34  ;;  %v1125_v19 = vadd.f32 %v1314_v5, %v1124_v39  ;;  %v1187_v4 = vsub.f32 0.0, %v1976_v34 }
 0x5ed   :  { %1238 = vmatpush.msra.mxu0 %v1215_v45  ;;  %1287 = vmatpush.msra.mxu1 %v1215_v45 }
 0x5ee   :  { %v1137_v42 = vadd.f32 1.0, %v1135_v38  ;;  %v1980_v62 = vadd.f32 %v1125_v19, %v1918_v17  ;;  %v1189_v7 = vmul.f32 %v1187_v4, %v1976_v34 }
 0x5ef   :  { %1239 = vmatpush.msra.mxu0 %v1214_v27  ;;  %1288 = vmatpush.msra.mxu1 %v1214_v27 }
 0x5f0   :  { %1372 = vrcp.f32 %v1137_v42  ;;  %v1983_v44 = vmul.f32 0.70710677, %v1980_v62  ;;  %v1150_v56 = vand.u32 2147483648, %v1137_v42  ;;  %v1148_v60 = vand.u32 2147483647, %v1137_v42 }
 0x5f1   :  { %1240 = vmatpush.msra.mxu0 %v1213_v50  ;;  %1289 = vmatpush.msra.mxu1 %v1213_v50  ;;  %vm1144_vm7 = vweird.f32 %v1137_v42  ;;  %v1191_v14 = vmul.f32 1.442695, %v1189_v7 }
 0x5f2   :  { %v1986_v46 = vand.u32 2147483647, %v1983_v44  ;;  %v1151_v41 = vor.u32 1.1754944e-38, %v1150_v56  ;;  %vm1149_vm9 = vcmp.eq.f32.partialorder %v1148_v60, 8.507059e+37  ;;  %vm1200_vm15 = vcmp.lt.f32.partialorder %v1983_v44, 0.0 }
 0x5f3   :  { %1241 = vmatpush.msra.mxu0 %v1212_v53  ;;  %1290 = vmatpush.msra.mxu1 %v1212_v53 }
 0x5f4   :  { %v1136_v48 = vmul.f32 0.3275911, %v1986_v46  ;;  %v1188_v20 = vsub.f32 0.0, %v1986_v46 }
 0x5f5   :  { %1242 = vmatpush.msra.mxu0 %v1211_v57  ;;  %1291 = vmatpush.msra.mxu1 %v1211_v57 }
 0x5f6   :  { %v1373_v17 = vpop.eup %1372  ;;  %v1138_v52 = vadd.f32 1.0, %v1136_v48  ;;  %v1190_v5 = vmul.f32 %v1188_v20, %v1986_v46 }
 0x5f7   :  { %v1140_v51 = vmul.f32 %v1373_v17, %v1137_v42  ;;  %vm1145_vm6 = vweird.f32 %v1373_v17  ;;  %1243 = vmatpush.msra.mxu0 %v1210_v61  ;;  %1292 = vmatpush.msra.mxu1 %v1210_v61 }
 0x5f8   :  { %1374 = vrcp.f32 %v1138_v52  ;;  %vm1146_vm8 = vmor %vm1144_vm7, %vm1145_vm6  ;;  %v1165_v6 = vand.u32 2147483648, %v1138_v52  ;;  %v1163_v9 = vand.u32 2147483647, %v1138_v52  ;;  %vm1159_vm11 = vweird.f32 %v1138_v52 }
 0x5f9   :  { %v1141_v55 = vsub.f32 1.0, %v1140_v51  ;;  %1244 = vmatpush.msra.mxu0 %v1209_v40  ;;  %1293 = vmatpush.msra.mxu1 %v1209_v40  ;;  %1376 = vpow2.f32 %v1191_v14  ;;  %v1193_v32 = vmul.f32 1.442695, %v1190_v5 }
 0x5fa   :  { %v1166_v13 = vor.u32 1.1754944e-38, %v1165_v6  ;;  %vm1164_vm13 = vcmp.eq.f32.partialorder %v1163_v9, 8.507059e+37 }
 0x5fb   :  { %v1142_v58 = vmul.f32 %v1373_v17, %v1141_v55  ;;  %1378 = vpow2.f32 %v1193_v32 }
 0x5fd   :  { %v1143_v63 = vadd.f32 %v1373_v17, %v1142_v58 }
 0x5fe   :  { %v1375_v1 = vpop.eup %1374 }
 0x5ff   :  { %v1147_v2 = vsel %vm1146_vm8, %v1373_v17, %v1143_v63  ;;  %v1155_v49 = vmul.f32 %v1375_v1, %v1138_v52  ;;  %vm1160_vm10 = vweird.f32 %v1375_v1  ;;  %v1377_v37 = vpop.eup %1376  ;;  %v1130_v52 = vmul.f32 0.5, %v1980_v62 }
 0x600   :  { %v1152_v3 = vsel %vm1149_vm9, %v1151_v41, %v1147_v2  ;;  %vm1161_vm12 = vmor %vm1159_vm11, %vm1160_vm10 }
 0x601   :  { %v1169_v35 = vmul.f32 1.0614054, %v1152_v3  ;;  %v1156_v47 = vsub.f32 1.0, %v1155_v49  ;;  %v1379_v46 = vpop.eup %1378 }
 0x603   :  { %v1171_v29 = vadd.f32 -1.4531521, %v1169_v35  ;;  %v1157_v8 = vmul.f32 %v1375_v1, %v1156_v47 }
 0x605   :  { %v1173_v59 = vmul.f32 %v1171_v29, %v1152_v3  ;;  %v1158_v54 = vadd.f32 %v1375_v1, %v1157_v8 }
 0x607   :  { %v1175_v12 = vadd.f32 1.4214138, %v1173_v59  ;;  %v1162_v15 = vsel %vm1161_vm12, %v1375_v1, %v1158_v54 }
 0x608   :  { %v1167_v18 = vsel %vm1164_vm13, %v1166_v13, %v1162_v15 }
 0x609   :  { %v1177_v0 = vmul.f32 %v1175_v12, %v1152_v3  ;;  %v1170_v21 = vmul.f32 1.0614054, %v1167_v18 }
 0x60b   :  { %v1179_v22 = vadd.f32 -0.28449672, %v1177_v0  ;;  %v1172_v23 = vadd.f32 -1.4531521, %v1170_v21 }
 0x60d   :  { %v1181_v24 = vmul.f32 %v1179_v22, %v1152_v3  ;;  %v1174_v26 = vmul.f32 %v1172_v23, %v1167_v18 }
 0x60f   :  { %v1183_v28 = vadd.f32 0.2548296, %v1181_v24  ;;  %v1176_v30 = vadd.f32 1.4214138, %v1174_v26 }
 0x611   :  { %v1185_v31 = vmul.f32 %v1183_v28, %v1152_v3  ;;  %v1178_v33 = vmul.f32 %v1176_v30, %v1167_v18 }
 0x613   :  { %v1195_v34 = vmul.f32 %v1377_v37, %v1185_v31  ;;  %v1180_v36 = vadd.f32 -0.28449672, %v1178_v33 }
 0x615   :  { %v1197_v38 = vsub.f32 1.0, %v1195_v34  ;;  %v1182_v39 = vmul.f32 %v1180_v36, %v1167_v18 }
 0x617   :  { %v1201_v10 = vsub.f32 0.0, %v1197_v38  ;;  %v1184_v19 = vadd.f32 0.2548296, %v1182_v39 }
 0x619   :  { %v1203_v42 = vsel %vm1199_vm14, %v1201_v10, %v1197_v38  ;;  %v1186_v45 = vmul.f32 %v1184_v19, %v1167_v18 }
 0x61a   :  { %v1205_v43 = vadd.f32 1.0, %v1203_v42 }
 0x61b   :  { %v1196_v48 = vmul.f32 %v1379_v46, %v1186_v45 }
 0x61c   :  { %v1207_v27 = vmul.f32 %v1205_v43, %v1129_v16 }
 0x61d   :  { %v1198_v17 = vsub.f32 1.0, %v1196_v48 }
 0x61e   :  { %1245 = vmatmul.f32.vlgmr.msra.gmra.mxu0 %v1207_v27 }
 0x61f   :  { %v1202_v50 = vsub.f32 0.0, %v1198_v17 }
 0x621   :  { %v1204_v51 = vsel %vm1200_vm15, %v1202_v50, %v1198_v17 }
 0x622   :  { %v1206_v53 = vadd.f32 1.0, %v1204_v51 }
 0x624   :  { %v1208_v55 = vmul.f32 %v1206_v53, %v1130_v52 }
 0x626   :  { %1248 = vmatmul.f32.vlgmr.msra.gmra.mxu1 %v1208_v55 }
 0x69b   :  { %v1246_v25 = vpop.f32.mrf.mxu0 }
 0x69c   :  { %v1247_v56 = vadd.f32 %v1315_v11, %v1246_v25 }
 0x69e   :  { %1252 = vst [vmem:[#allocation19] sm:$0xff] %v1247_v56 }
 0x6a3   :  { %v1249_v44 = vpop.f32.mrf.mxu1 }
 0x6a4   :  { %v1250_v57 = vadd.f32 %v1315_v11, %v1249_v44 }
 0x6a6   :  { %1253 = vst [vmem:[#allocation19 + $0x8] sm:$0xff] %v1250_v57 }
 0x6a7   :  { %1266 = dma.vmem_to_hbm [thread:$0]  %s1259_s11, 256, %s1261_s0, [#allocation4], %s1659_s25, %s1659_s25, %s1660_s3  }
 0x6a8   :  { %1656 = dma.done.wait [#allocation4], 256  }
 0x6a9   :  { %1657 = vsyncadd [#allocation4], 4294967040 }
 0x6aa   :  { %1271 = vsyncpa [#allocation3], 1 }
 0x6ab   :  { %1272 = vsyncpa [#allocation6], 1 }
 0x6ac   :  { %1273 = vsyncpa [#allocation9], 1 }
 0x6ad   :  { %1274 = vsyncpa [#allocation12], 1 }
 0x6ae   :  { %1275 = vsyncpa [#allocation15], 1 }
 0x6af   :  { %1276 = vsyncpa [#allocation18], 1 }
 0x6b0   :  { %1277 = vsyncpa [#allocation4], 1 }

</bundles_post_ra>
